<compile_context>
chip_gen: v5e
topology: v5e:2x2
jax: 0.10.0
libtpu: 0.0.40
codegen_flags: <defaults>
</compile_context>

<pallas_src>
import functools

import jax
import jax.numpy as jnp
from jax.experimental import pallas as pl
from jax.experimental.pallas import tpu as pltpu

_EIG_CLAMP = 1e-10  # guard for sqrt / isqrt / log of near-singular SPD eigenvalues


# ----------------------------- Pallas kernels ------------------------------ #

def _congruence_kernel(x_ref, c_ref, o_ref, bd_ref, *, B, n):
    """Column-block b of output = C @ X[b] @ C   (C assumed SYMMETRIC).

    x_ref : (n, B*n) packed, block b = X[b]
    c_ref : (n, n) symmetric (here always an inverse-square-root matrix)
    bd_ref: (B*n, B*n) VMEM scratch — blockdiag(C) built in-kernel, never HBM.
    """
    c = c_ref[...]
    bd_ref[...] = jnp.zeros_like(bd_ref)
    for b in range(B):                                   # B small block stores (masked vst)
        bd_ref[b * n:(b + 1) * n, b * n:(b + 1) * n] = c
    y = jnp.dot(c, x_ref[...], preferred_element_type=jnp.float32)
    o_ref[...] = jnp.dot(y, bd_ref[...],
                         preferred_element_type=jnp.float32).astype(o_ref.dtype)


def _reconstruct_kernel(u_ref, ut_ref, v_ref, o_ref, bd_ref, *, B, n, reduce_mean):
    """Column-block b = U[b] diag(v[b]) U[b]^T.

    u_ref : (n, B*n)  packed, block b = U[b]
    ut_ref: (B*n, n)  row-block b = U[b]^T   (layout plumbing from the wrapper)
    v_ref : (1, B*n)  lane-dense row of per-block eigen scalings
    bd_ref: (B*n, B*n) VMEM scratch — blockdiag(U[b]^T) built in-kernel.

    If reduce_mean: emit the (n, n) mean over the B blocks instead of the
    packed slab (used for the Karcher tangent-space mean).
    """
    bd_ref[...] = jnp.zeros_like(bd_ref)
    for b in range(B):
        bd_ref[b * n:(b + 1) * n, b * n:(b + 1) * n] = ut_ref[b * n:(b + 1) * n, :]
    z = u_ref[...] * v_ref[...]                                         # VPU column scale
    r = jnp.dot(z, bd_ref[...], preferred_element_type=jnp.float32)     # (n, B*n)
    if reduce_mean:
        acc = r[:, 0:n]
        for b in range(1, B):                                           # in-VMEM block reduce
            acc = acc + r[:, b * n:(b + 1) * n]
        o_ref[...] = (acc * (1.0 / B)).astype(o_ref.dtype)
    else:
        o_ref[...] = r.astype(o_ref.dtype)


# --------------------------- packing / call helpers ------------------------- #

def _pack(x):
    """(B, n, n) -> (n, B*n): column-block b holds X[b]."""
    B, n, _ = x.shape
    return jnp.transpose(x, (1, 0, 2)).reshape(n, B * n)


def _unpack(xp, B, n):
    """(n, B*n) -> (B, n, n)."""
    return jnp.transpose(xp.reshape(n, B, n), (1, 0, 2))


def _single_step_call(kernel, in_shapes, out_shape, scratch_shapes):
    # All arrays are 2D; one grid step, full-array blocks, lane-dense slabs.
    # TODO(synk): for larger batches, add a leading "parallel" grid axis
    # (multiples of 128 lanes per half) to use both v7x TensorCores, and pack
    # to B*n multiples of 256 to fill the v6e/v7x MXU width.
    return pl.pallas_call(
        kernel,
        out_shape=jax.ShapeDtypeStruct(out_shape, jnp.float32),
        grid_spec=pltpu.PrefetchScalarGridSpec(
            num_scalar_prefetch=0,
            grid=(1,),
            in_specs=[pl.BlockSpec(s, lambda i: (0, 0)) for s in in_shapes],
            out_specs=pl.BlockSpec(out_shape, lambda i: (0, 0)),
            scratch_shapes=scratch_shapes,
        ),
        compiler_params=pltpu.CompilerParams(dimension_semantics=("arbitrary",)),
    )


def congruence_packed(x_packed, c_sym, B, n):
    """Packed congruence with a symmetric C: block b of result = C @ X[b] @ C."""
    Bn = B * n
    kern = functools.partial(_congruence_kernel, B=B, n=n)
    call = _single_step_call(kern, [(n, Bn), (n, n)], (n, Bn),
                             [pltpu.VMEM((Bn, Bn), jnp.float32)])
    return call(x_packed, c_sym)


def reconstruct_packed(U, v, B, n, reduce_mean=False):
    """Packed eigen-reconstruction: block b = U[b] diag(v[b]) U[b]^T.

    reduce_mean=True returns the (n, n) mean of the B blocks (Karcher tangent mean).
    """
    Bn = B * n
    u_packed = jnp.transpose(U, (1, 0, 2)).reshape(n, Bn)       # block b = U[b]
    ut_rows = jnp.transpose(U, (0, 2, 1)).reshape(Bn, n)        # row-block b = U[b]^T
    v_row = v.reshape(1, Bn).astype(jnp.float32)
    kern = functools.partial(_reconstruct_kernel, B=B, n=n, reduce_mean=reduce_mean)
    out_shape = (n, n) if reduce_mean else (n, Bn)
    call = _single_step_call(kern, [(n, Bn), (Bn, n), (1, Bn)], out_shape,
                             [pltpu.VMEM((Bn, Bn), jnp.float32)])
    return call(u_packed, ut_rows, v_row)


# --------------------------- JAX glue (eigh etc.) --------------------------- #

def _eigh_clamped(m):
    """eigh with eigenvalues clamped for the sqrt / isqrt / log paths."""
    lam, U = jnp.linalg.eigh(m)
    return jnp.maximum(lam, _EIG_CLAMP), U


def _sym_from_eig(U, w):
    """U diag(w) U^T for a single (n, n) eigenbasis."""
    return (U * w[None, :]) @ U.T


def _sym_exp(T):
    """Matrix exp of a symmetric (NOT necessarily SPD) matrix — no clamping."""
    lam, U = jnp.linalg.eigh(T)
    return _sym_from_eig(U, jnp.exp(lam))


def karcher_flow_airm(x, x_packed, B, n, steps):
    """Batch Fréchet mean of SPD matrices under AIRM via Karcher flow.

    Returns (mean, mean^{-1/2}); the final eigh is shared between them.
    # TODO(synk): reference karcher_flow implementation not provided;
    # arithmetic-mean initialization + standard AIRM Karcher update is used.
    """
    G = jnp.mean(x, axis=0)                       # init straight from x (no unpack)
    lamG, UG = _eigh_clamped(G)
    for _ in range(steps):
        sq = jnp.sqrt(lamG)
        G_sqrt = _sym_from_eig(UG, sq)            # one eigh -> both sqrt and isqrt
        G_isqrt = _sym_from_eig(UG, 1.0 / sq)
        Yp = congruence_packed(x_packed, G_isqrt, B, n)       # Pallas: whiten by current mean
        lam, U = _eigh_clamped(_unpack(Yp, B, n))             # batched eigh (no Pallas eq.)
        T = reconstruct_packed(U, jnp.log(lam), B, n,
                               reduce_mean=True)              # Pallas: mean of logm(Y_i)
        G = G_sqrt @ _sym_exp(T) @ G_sqrt                     # exp of symmetric T: no clamp
        lamG, UG = _eigh_clamped(G)
    m_isqrt = _sym_from_eig(UG, 1.0 / jnp.sqrt(lamG))         # reuse final eigh
    return G, m_isqrt


def riemannian_batch_norm_fwd(x, shift, scale, *, karcher_flow_steps=1, eps=1e-5):
    """Training-mode forward of RiemannianBatchNorm (metric='airm').

    Order of operations (matches reference): Whiten -> Scale (matrix power) -> Shift.
    # TODO(synk): only metric='airm' is implemented ('lem'/'euclidean' unused).
    # TODO(synk): running_mean / running_var EMA updates are stateful buffer
    #             side effects and not part of the functional output; omitted.
    """
    B, n, _ = x.shape
    x = x.astype(jnp.float32)
    x_packed = _pack(x)

    # 1) batch Fréchet mean and its inverse square root (shared eigh)
    _mean, m_isqrt = karcher_flow_airm(x, x_packed, B, n, karcher_flow_steps)

    # 2) whiten ONCE; the batched eigh is reused for BOTH the batch variance
    #    (AIRM squared distance to the mean) and the matrix power.
    xw_packed = congruence_packed(x_packed, m_isqrt, B, n)        # Pallas
    lam, U = _eigh_clamped(_unpack(xw_packed, B, n))              # batched eigh
    log_lam = jnp.log(lam)                                        # (B, n)

    var = jnp.mean(jnp.sum(log_lam ** 2, axis=-1))                # 1/B estimator, per reference
    std = jnp.sqrt(var)

    # 3) shift^{1/2} (U diag(lam^p) U^T) shift^{1/2}
    #    = (shift^{1/2} U) diag(lam^p) (shift^{1/2} U)^T  -> reconstruct kernel only
    p = scale / (std + eps)                                       # eps placement per reference
    v = jnp.exp(p * log_lam)                                      # lam^p, (B, n)
    lamS, US = _eigh_clamped(shift.astype(jnp.float32))
    s_sqrt = _sym_from_eig(US, jnp.sqrt(lamS))
    CU = jnp.einsum('ij,bjk->bik', s_sqrt, U)                     # tiny batched XLA matmul
    out_packed = reconstruct_packed(CU, v, B, n, reduce_mean=False)  # Pallas
    return _unpack(out_packed, B, n)


# ---------------------------------- main ----------------------------------- #

if __name__ == "__main__":
    B, n = 8, 16                                          # B*n = 128 -> one lane-dense slab
    key = jax.random.PRNGKey(0)
    a = jax.random.normal(key, (B, n, n), dtype=jnp.float32)
    x = a @ jnp.swapaxes(a, -1, -2) / n + 0.5 * jnp.eye(n, dtype=jnp.float32)  # SPD batch

    # Parameters as in RiemannianBatchNorm.__init__(num_spatial=n, shift=True, scale=True):
    shift = jnp.eye(n, dtype=jnp.float32)                 # SPDParameter init: identity
    scale = jnp.ones((1,), dtype=jnp.float32)             # scalar scale init: 1

    fwd = jax.jit(functools.partial(riemannian_batch_norm_fwd,
                                    karcher_flow_steps=1, eps=1e-5))
    out = jax.block_until_ready(fwd(x, shift, scale))

    assert out.shape == (B, n, n)
    assert bool(jnp.all(jnp.isfinite(out)))
    # outputs must remain symmetric SPD-ish
    assert bool(jnp.allclose(out, jnp.swapaxes(out, -1, -2), atol=1e-4))
    print("KERNEL_OK")
</pallas_src>

<mosaic_0001>
module attributes {stable_mosaic.version = 11 : i64} {
  func.func @_congruence_kernel(%arg0: i32, %arg1: memref<16x128xf32, #tpu.memory_space<vmem>>, %arg2: memref<16x16xf32, #tpu.memory_space<vmem>>, %arg3: memref<16x128xf32, #tpu.memory_space<vmem>>, %arg4: memref<128x128xf32, #tpu.memory_space<vmem>>) attributes {dimension_semantics = [#tpu.dimension_semantics<arbitrary>], iteration_bounds = array<i64: 1>, scalar_prefetch = 0 : i64, scratch_operands = 1 : i64, tpu.core_type = #tpu.core_type<tc>, window_params = [{pipeline_mode = #tpu.pipeline_mode<synchronous>, transform_indices = @transform_0, window_bounds = array<i64: 16, 128>}, {pipeline_mode = #tpu.pipeline_mode<synchronous>, transform_indices = @transform_1, window_bounds = array<i64: 16, 16>}, {pipeline_mode = #tpu.pipeline_mode<synchronous>, transform_indices = @transform_2, window_bounds = array<i64: 16, 128>}]} {
    %c0 = arith.constant 0 : index
    %c0_0 = arith.constant 0 : index
    %0 = vector.load %arg2[%c0, %c0_0] : memref<16x16xf32, #tpu.memory_space<vmem>>, vector<16x16xf32>
    %cst = arith.constant 0.000000e+00 : f32
    %1 = vector.broadcast %cst : f32 to vector<128x128xf32>
    %c0_1 = arith.constant 0 : index
    %c0_2 = arith.constant 0 : index
    %2 = vector.load %arg4[%c0_1, %c0_2] : memref<128x128xf32, #tpu.memory_space<vmem>>, vector<128x128xf32>
    tpu.vector_store %arg4[%c0_1, %c0_2], %1 {strides = array<i32>} : memref<128x128xf32, #tpu.memory_space<vmem>>, vector<128x128xf32>,
    %c0_3 = arith.constant 0 : index
    %c0_4 = arith.constant 0 : index
    %3 = vector.load %arg4[%c0_3, %c0_4] : memref<128x128xf32, #tpu.memory_space<vmem>>, vector<16x16xf32>
    tpu.vector_store %arg4[%c0_3, %c0_4], %0 {strides = array<i32>} : memref<128x128xf32, #tpu.memory_space<vmem>>, vector<16x16xf32>,
    %c16 = arith.constant 16 : index
    %c16_5 = arith.constant 16 : index
    %4 = vector.load %arg4[%c16, %c16_5] : memref<128x128xf32, #tpu.memory_space<vmem>>, vector<16x16xf32>
    tpu.vector_store %arg4[%c16, %c16_5], %0 {strides = array<i32>} : memref<128x128xf32, #tpu.memory_space<vmem>>, vector<16x16xf32>,
    %c32 = arith.constant 32 : index
    %c32_6 = arith.constant 32 : index
    %5 = vector.load %arg4[%c32, %c32_6] : memref<128x128xf32, #tpu.memory_space<vmem>>, vector<16x16xf32>
    tpu.vector_store %arg4[%c32, %c32_6], %0 {strides = array<i32>} : memref<128x128xf32, #tpu.memory_space<vmem>>, vector<16x16xf32>,
    %c48 = arith.constant 48 : index
    %c48_7 = arith.constant 48 : index
    %6 = vector.load %arg4[%c48, %c48_7] : memref<128x128xf32, #tpu.memory_space<vmem>>, vector<16x16xf32>
    tpu.vector_store %arg4[%c48, %c48_7], %0 {strides = array<i32>} : memref<128x128xf32, #tpu.memory_space<vmem>>, vector<16x16xf32>,
    %c64 = arith.constant 64 : index
    %c64_8 = arith.constant 64 : index
    %7 = vector.load %arg4[%c64, %c64_8] : memref<128x128xf32, #tpu.memory_space<vmem>>, vector<16x16xf32>
    tpu.vector_store %arg4[%c64, %c64_8], %0 {strides = array<i32>} : memref<128x128xf32, #tpu.memory_space<vmem>>, vector<16x16xf32>,
    %c80 = arith.constant 80 : index
    %c80_9 = arith.constant 80 : index
    %8 = vector.load %arg4[%c80, %c80_9] : memref<128x128xf32, #tpu.memory_space<vmem>>, vector<16x16xf32>
    tpu.vector_store %arg4[%c80, %c80_9], %0 {strides = array<i32>} : memref<128x128xf32, #tpu.memory_space<vmem>>, vector<16x16xf32>,
    %c96 = arith.constant 96 : index
    %c96_10 = arith.constant 96 : index
    %9 = vector.load %arg4[%c96, %c96_10] : memref<128x128xf32, #tpu.memory_space<vmem>>, vector<16x16xf32>
    tpu.vector_store %arg4[%c96, %c96_10], %0 {strides = array<i32>} : memref<128x128xf32, #tpu.memory_space<vmem>>, vector<16x16xf32>,
    %c112 = arith.constant 112 : index
    %c112_11 = arith.constant 112 : index
    %10 = vector.load %arg4[%c112, %c112_11] : memref<128x128xf32, #tpu.memory_space<vmem>>, vector<16x16xf32>
    tpu.vector_store %arg4[%c112, %c112_11], %0 {strides = array<i32>} : memref<128x128xf32, #tpu.memory_space<vmem>>, vector<16x16xf32>,
    %c0_12 = arith.constant 0 : index
    %c0_13 = arith.constant 0 : index
    %11 = vector.load %arg1[%c0_12, %c0_13] : memref<16x128xf32, #tpu.memory_space<vmem>>, vector<16x128xf32>
    %cst_14 = arith.constant dense<0.000000e+00> : vector<16x128xf32>
    %12 = tpu.matmul %0, %11, %cst_14 {dimension_numbers = #tpu.dot_dimension_numbers<[1], [0], [0], [1], [0, 0, 1, 1], [], []>} : vector<16x16xf32>, vector<16x128xf32>, vector<16x128xf32> -> vector<16x128xf32>
    %c0_15 = arith.constant 0 : index
    %c0_16 = arith.constant 0 : index
    %13 = vector.load %arg4[%c0_15, %c0_16] : memref<128x128xf32, #tpu.memory_space<vmem>>, vector<128x128xf32>
    %cst_17 = arith.constant dense<0.000000e+00> : vector<16x128xf32>
    %14 = tpu.matmul %12, %13, %cst_17 {dimension_numbers = #tpu.dot_dimension_numbers<[1], [0], [0], [1], [0, 0, 1, 1], [], []>} : vector<16x128xf32>, vector<128x128xf32>, vector<16x128xf32> -> vector<16x128xf32>
    %c0_18 = arith.constant 0 : index
    %c0_19 = arith.constant 0 : index
    %15 = vector.load %arg3[%c0_18, %c0_19] : memref<16x128xf32, #tpu.memory_space<vmem>>, vector<16x128xf32>
    tpu.vector_store %arg3[%c0_18, %c0_19], %14 {strides = array<i32>} : memref<16x128xf32, #tpu.memory_space<vmem>>, vector<16x128xf32>,
    return
  }
  func.func @transform_0(%arg0: i32) -> (i32, i32) {
    %c0_i32 = arith.constant 0 : i32
    %c0_i32_0 = arith.constant 0 : i32
    %c0_i32_1 = arith.constant 0 : i32
    return %c0_i32, %c0_i32_0 : i32, i32
  }
  func.func @transform_1(%arg0: i32) -> (i32, i32) {
    %c0_i32 = arith.constant 0 : i32
    %c0_i32_0 = arith.constant 0 : i32
    %c0_i32_1 = arith.constant 0 : i32
    return %c0_i32, %c0_i32_0 : i32, i32
  }
  func.func @transform_2(%arg0: i32) -> (i32, i32) {
    %c0_i32 = arith.constant 0 : i32
    %c0_i32_0 = arith.constant 0 : i32
    %c0_i32_1 = arith.constant 0 : i32
    return %c0_i32, %c0_i32_0 : i32, i32
  }
}

module attributes {stable_mosaic.version = 11 : i64} {
  func.func @_reconstruct_kernel(%arg0: i32, %arg1: memref<16x128xf32, #tpu.memory_space<vmem>>, %arg2: memref<128x16xf32, #tpu.memory_space<vmem>>, %arg3: memref<1x128xf32, #tpu.memory_space<vmem>>, %arg4: memref<16x16xf32, #tpu.memory_space<vmem>>, %arg5: memref<128x128xf32, #tpu.memory_space<vmem>>) attributes {dimension_semantics = [#tpu.dimension_semantics<arbitrary>], iteration_bounds = array<i64: 1>, scalar_prefetch = 0 : i64, scratch_operands = 1 : i64, tpu.core_type = #tpu.core_type<tc>, window_params = [{pipeline_mode = #tpu.pipeline_mode<synchronous>, transform_indices = @transform_0, window_bounds = array<i64: 16, 128>}, {pipeline_mode = #tpu.pipeline_mode<synchronous>, transform_indices = @transform_1, window_bounds = array<i64: 128, 16>}, {pipeline_mode = #tpu.pipeline_mode<synchronous>, transform_indices = @transform_2, window_bounds = array<i64: 1, 128>}, {pipeline_mode = #tpu.pipeline_mode<synchronous>, transform_indices = @transform_3, window_bounds = array<i64: 16, 16>}]} {
    %cst = arith.constant 0.000000e+00 : f32
    %0 = vector.broadcast %cst : f32 to vector<128x128xf32>
    %c0 = arith.constant 0 : index
    %c0_0 = arith.constant 0 : index
    %1 = vector.load %arg5[%c0, %c0_0] : memref<128x128xf32, #tpu.memory_space<vmem>>, vector<128x128xf32>
    tpu.vector_store %arg5[%c0, %c0_0], %0 {strides = array<i32>} : memref<128x128xf32, #tpu.memory_space<vmem>>, vector<128x128xf32>,
    %c0_1 = arith.constant 0 : index
    %c0_2 = arith.constant 0 : index
    %2 = vector.load %arg2[%c0_1, %c0_2] : memref<128x16xf32, #tpu.memory_space<vmem>>, vector<16x16xf32>
    %c0_3 = arith.constant 0 : index
    %c0_4 = arith.constant 0 : index
    %3 = vector.load %arg5[%c0_3, %c0_4] : memref<128x128xf32, #tpu.memory_space<vmem>>, vector<16x16xf32>
    tpu.vector_store %arg5[%c0_3, %c0_4], %2 {strides = array<i32>} : memref<128x128xf32, #tpu.memory_space<vmem>>, vector<16x16xf32>,
    %c16 = arith.constant 16 : index
    %c0_5 = arith.constant 0 : index
    %4 = vector.load %arg2[%c16, %c0_5] : memref<128x16xf32, #tpu.memory_space<vmem>>, vector<16x16xf32>
    %c16_6 = arith.constant 16 : index
    %c16_7 = arith.constant 16 : index
    %5 = vector.load %arg5[%c16_6, %c16_7] : memref<128x128xf32, #tpu.memory_space<vmem>>, vector<16x16xf32>
    tpu.vector_store %arg5[%c16_6, %c16_7], %4 {strides = array<i32>} : memref<128x128xf32, #tpu.memory_space<vmem>>, vector<16x16xf32>,
    %c32 = arith.constant 32 : index
    %c0_8 = arith.constant 0 : index
    %6 = vector.load %arg2[%c32, %c0_8] : memref<128x16xf32, #tpu.memory_space<vmem>>, vector<16x16xf32>
    %c32_9 = arith.constant 32 : index
    %c32_10 = arith.constant 32 : index
    %7 = vector.load %arg5[%c32_9, %c32_10] : memref<128x128xf32, #tpu.memory_space<vmem>>, vector<16x16xf32>
    tpu.vector_store %arg5[%c32_9, %c32_10], %6 {strides = array<i32>} : memref<128x128xf32, #tpu.memory_space<vmem>>, vector<16x16xf32>,
    %c48 = arith.constant 48 : index
    %c0_11 = arith.constant 0 : index
    %8 = vector.load %arg2[%c48, %c0_11] : memref<128x16xf32, #tpu.memory_space<vmem>>, vector<16x16xf32>
    %c48_12 = arith.constant 48 : index
    %c48_13 = arith.constant 48 : index
    %9 = vector.load %arg5[%c48_12, %c48_13] : memref<128x128xf32, #tpu.memory_space<vmem>>, vector<16x16xf32>
    tpu.vector_store %arg5[%c48_12, %c48_13], %8 {strides = array<i32>} : memref<128x128xf32, #tpu.memory_space<vmem>>, vector<16x16xf32>,
    %c64 = arith.constant 64 : index
    %c0_14 = arith.constant 0 : index
    %10 = vector.load %arg2[%c64, %c0_14] : memref<128x16xf32, #tpu.memory_space<vmem>>, vector<16x16xf32>
    %c64_15 = arith.constant 64 : index
    %c64_16 = arith.constant 64 : index
    %11 = vector.load %arg5[%c64_15, %c64_16] : memref<128x128xf32, #tpu.memory_space<vmem>>, vector<16x16xf32>
    tpu.vector_store %arg5[%c64_15, %c64_16], %10 {strides = array<i32>} : memref<128x128xf32, #tpu.memory_space<vmem>>, vector<16x16xf32>,
    %c80 = arith.constant 80 : index
    %c0_17 = arith.constant 0 : index
    %12 = vector.load %arg2[%c80, %c0_17] : memref<128x16xf32, #tpu.memory_space<vmem>>, vector<16x16xf32>
    %c80_18 = arith.constant 80 : index
    %c80_19 = arith.constant 80 : index
    %13 = vector.load %arg5[%c80_18, %c80_19] : memref<128x128xf32, #tpu.memory_space<vmem>>, vector<16x16xf32>
    tpu.vector_store %arg5[%c80_18, %c80_19], %12 {strides = array<i32>} : memref<128x128xf32, #tpu.memory_space<vmem>>, vector<16x16xf32>,
    %c96 = arith.constant 96 : index
    %c0_20 = arith.constant 0 : index
    %14 = vector.load %arg2[%c96, %c0_20] : memref<128x16xf32, #tpu.memory_space<vmem>>, vector<16x16xf32>
    %c96_21 = arith.constant 96 : index
    %c96_22 = arith.constant 96 : index
    %15 = vector.load %arg5[%c96_21, %c96_22] : memref<128x128xf32, #tpu.memory_space<vmem>>, vector<16x16xf32>
    tpu.vector_store %arg5[%c96_21, %c96_22], %14 {strides = array<i32>} : memref<128x128xf32, #tpu.memory_space<vmem>>, vector<16x16xf32>,
    %c112 = arith.constant 112 : index
    %c0_23 = arith.constant 0 : index
    %16 = vector.load %arg2[%c112, %c0_23] : memref<128x16xf32, #tpu.memory_space<vmem>>, vector<16x16xf32>
    %c112_24 = arith.constant 112 : index
    %c112_25 = arith.constant 112 : index
    %17 = vector.load %arg5[%c112_24, %c112_25] : memref<128x128xf32, #tpu.memory_space<vmem>>, vector<16x16xf32>
    tpu.vector_store %arg5[%c112_24, %c112_25], %16 {strides = array<i32>} : memref<128x128xf32, #tpu.memory_space<vmem>>, vector<16x16xf32>,
    %c0_26 = arith.constant 0 : index
    %c0_27 = arith.constant 0 : index
    %18 = vector.load %arg1[%c0_26, %c0_27] : memref<16x128xf32, #tpu.memory_space<vmem>>, vector<16x128xf32>
    %c0_28 = arith.constant 0 : index
    %c0_29 = arith.constant 0 : index
    %19 = vector.load %arg3[%c0_28, %c0_29] : memref<1x128xf32, #tpu.memory_space<vmem>>, vector<1x128xf32>
    %20 = vector.broadcast %19 : vector<1x128xf32> to vector<16x128xf32>
    %21 = arith.mulf %18, %20 : vector<16x128xf32>
    %c0_30 = arith.constant 0 : index
    %c0_31 = arith.constant 0 : index
    %22 = vector.load %arg5[%c0_30, %c0_31] : memref<128x128xf32, #tpu.memory_space<vmem>>, vector<128x128xf32>
    %cst_32 = arith.constant dense<0.000000e+00> : vector<16x128xf32>
    %23 = tpu.matmul %21, %22, %cst_32 {dimension_numbers = #tpu.dot_dimension_numbers<[1], [0], [0], [1], [0, 0, 1, 1], [], []>} : vector<16x128xf32>, vector<128x128xf32>, vector<16x128xf32> -> vector<16x128xf32>
    %24 = vector.extract_strided_slice %23 {offsets = [0, 0], sizes = [16, 16], strides = [1, 1]} : vector<16x128xf32> to vector<16x16xf32>
    %25 = vector.extract_strided_slice %23 {offsets = [0, 16], sizes = [16, 16], strides = [1, 1]} : vector<16x128xf32> to vector<16x16xf32>
    %26 = arith.addf %24, %25 : vector<16x16xf32>
    %27 = vector.extract_strided_slice %23 {offsets = [0, 32], sizes = [16, 16], strides = [1, 1]} : vector<16x128xf32> to vector<16x16xf32>
    %28 = arith.addf %26, %27 : vector<16x16xf32>
    %29 = vector.extract_strided_slice %23 {offsets = [0, 48], sizes = [16, 16], strides = [1, 1]} : vector<16x128xf32> to vector<16x16xf32>
    %30 = arith.addf %28, %29 : vector<16x16xf32>
    %31 = vector.extract_strided_slice %23 {offsets = [0, 64], sizes = [16, 16], strides = [1, 1]} : vector<16x128xf32> to vector<16x16xf32>
    %32 = arith.addf %30, %31 : vector<16x16xf32>
    %33 = vector.extract_strided_slice %23 {offsets = [0, 80], sizes = [16, 16], strides = [1, 1]} : vector<16x128xf32> to vector<16x16xf32>
    %34 = arith.addf %32, %33 : vector<16x16xf32>
    %35 = vector.extract_strided_slice %23 {offsets = [0, 96], sizes = [16, 16], strides = [1, 1]} : vector<16x128xf32> to vector<16x16xf32>
    %36 = arith.addf %34, %35 : vector<16x16xf32>
    %37 = vector.extract_strided_slice %23 {offsets = [0, 112], sizes = [16, 16], strides = [1, 1]} : vector<16x128xf32> to vector<16x16xf32>
    %38 = arith.addf %36, %37 : vector<16x16xf32>
    %cst_33 = arith.constant 1.250000e-01 : f32
    %39 = vector.broadcast %cst_33 : f32 to vector<16x16xf32>
    %40 = arith.mulf %38, %39 : vector<16x16xf32>
    %c0_34 = arith.constant 0 : index
    %c0_35 = arith.constant 0 : index
    %41 = vector.load %arg4[%c0_34, %c0_35] : memref<16x16xf32, #tpu.memory_space<vmem>>, vector<16x16xf32>
    tpu.vector_store %arg4[%c0_34, %c0_35], %40 {strides = array<i32>} : memref<16x16xf32, #tpu.memory_space<vmem>>, vector<16x16xf32>,
    return
  }
  func.func @transform_0(%arg0: i32) -> (i32, i32) {
    %c0_i32 = arith.constant 0 : i32
    %c0_i32_0 = arith.constant 0 : i32
    %c0_i32_1 = arith.constant 0 : i32
    return %c0_i32, %c0_i32_0 : i32, i32
  }
  func.func @transform_1(%arg0: i32) -> (i32, i32) {
    %c0_i32 = arith.constant 0 : i32
    %c0_i32_0 = arith.constant 0 : i32
    %c0_i32_1 = arith.constant 0 : i32
    return %c0_i32, %c0_i32_0 : i32, i32
  }
  func.func @transform_2(%arg0: i32) -> (i32, i32) {
    %c0_i32 = arith.constant 0 : i32
    %c0_i32_0 = arith.constant 0 : i32
    %c0_i32_1 = arith.constant 0 : i32
    return %c0_i32, %c0_i32_0 : i32, i32
  }
  func.func @transform_3(%arg0: i32) -> (i32, i32) {
    %c0_i32 = arith.constant 0 : i32
    %c0_i32_0 = arith.constant 0 : i32
    %c0_i32_1 = arith.constant 0 : i32
    return %c0_i32, %c0_i32_0 : i32, i32
  }
}

module attributes {stable_mosaic.version = 11 : i64} {
  func.func @_reconstruct_kernel(%arg0: i32, %arg1: memref<16x128xf32, #tpu.memory_space<vmem>>, %arg2: memref<128x16xf32, #tpu.memory_space<vmem>>, %arg3: memref<1x128xf32, #tpu.memory_space<vmem>>, %arg4: memref<16x128xf32, #tpu.memory_space<vmem>>, %arg5: memref<128x128xf32, #tpu.memory_space<vmem>>) attributes {dimension_semantics = [#tpu.dimension_semantics<arbitrary>], iteration_bounds = array<i64: 1>, scalar_prefetch = 0 : i64, scratch_operands = 1 : i64, tpu.core_type = #tpu.core_type<tc>, window_params = [{pipeline_mode = #tpu.pipeline_mode<synchronous>, transform_indices = @transform_0, window_bounds = array<i64: 16, 128>}, {pipeline_mode = #tpu.pipeline_mode<synchronous>, transform_indices = @transform_1, window_bounds = array<i64: 128, 16>}, {pipeline_mode = #tpu.pipeline_mode<synchronous>, transform_indices = @transform_2, window_bounds = array<i64: 1, 128>}, {pipeline_mode = #tpu.pipeline_mode<synchronous>, transform_indices = @transform_3, window_bounds = array<i64: 16, 128>}]} {
    %cst = arith.constant 0.000000e+00 : f32
    %0 = vector.broadcast %cst : f32 to vector<128x128xf32>
    %c0 = arith.constant 0 : index
    %c0_0 = arith.constant 0 : index
    %1 = vector.load %arg5[%c0, %c0_0] : memref<128x128xf32, #tpu.memory_space<vmem>>, vector<128x128xf32>
    tpu.vector_store %arg5[%c0, %c0_0], %0 {strides = array<i32>} : memref<128x128xf32, #tpu.memory_space<vmem>>, vector<128x128xf32>,
    %c0_1 = arith.constant 0 : index
    %c0_2 = arith.constant 0 : index
    %2 = vector.load %arg2[%c0_1, %c0_2] : memref<128x16xf32, #tpu.memory_space<vmem>>, vector<16x16xf32>
    %c0_3 = arith.constant 0 : index
    %c0_4 = arith.constant 0 : index
    %3 = vector.load %arg5[%c0_3, %c0_4] : memref<128x128xf32, #tpu.memory_space<vmem>>, vector<16x16xf32>
    tpu.vector_store %arg5[%c0_3, %c0_4], %2 {strides = array<i32>} : memref<128x128xf32, #tpu.memory_space<vmem>>, vector<16x16xf32>,
    %c16 = arith.constant 16 : index
    %c0_5 = arith.constant 0 : index
    %4 = vector.load %arg2[%c16, %c0_5] : memref<128x16xf32, #tpu.memory_space<vmem>>, vector<16x16xf32>
    %c16_6 = arith.constant 16 : index
    %c16_7 = arith.constant 16 : index
    %5 = vector.load %arg5[%c16_6, %c16_7] : memref<128x128xf32, #tpu.memory_space<vmem>>, vector<16x16xf32>
    tpu.vector_store %arg5[%c16_6, %c16_7], %4 {strides = array<i32>} : memref<128x128xf32, #tpu.memory_space<vmem>>, vector<16x16xf32>,
    %c32 = arith.constant 32 : index
    %c0_8 = arith.constant 0 : index
    %6 = vector.load %arg2[%c32, %c0_8] : memref<128x16xf32, #tpu.memory_space<vmem>>, vector<16x16xf32>
    %c32_9 = arith.constant 32 : index
    %c32_10 = arith.constant 32 : index
    %7 = vector.load %arg5[%c32_9, %c32_10] : memref<128x128xf32, #tpu.memory_space<vmem>>, vector<16x16xf32>
    tpu.vector_store %arg5[%c32_9, %c32_10], %6 {strides = array<i32>} : memref<128x128xf32, #tpu.memory_space<vmem>>, vector<16x16xf32>,
    %c48 = arith.constant 48 : index
    %c0_11 = arith.constant 0 : index
    %8 = vector.load %arg2[%c48, %c0_11] : memref<128x16xf32, #tpu.memory_space<vmem>>, vector<16x16xf32>
    %c48_12 = arith.constant 48 : index
    %c48_13 = arith.constant 48 : index
    %9 = vector.load %arg5[%c48_12, %c48_13] : memref<128x128xf32, #tpu.memory_space<vmem>>, vector<16x16xf32>
    tpu.vector_store %arg5[%c48_12, %c48_13], %8 {strides = array<i32>} : memref<128x128xf32, #tpu.memory_space<vmem>>, vector<16x16xf32>,
    %c64 = arith.constant 64 : index
    %c0_14 = arith.constant 0 : index
    %10 = vector.load %arg2[%c64, %c0_14] : memref<128x16xf32, #tpu.memory_space<vmem>>, vector<16x16xf32>
    %c64_15 = arith.constant 64 : index
    %c64_16 = arith.constant 64 : index
    %11 = vector.load %arg5[%c64_15, %c64_16] : memref<128x128xf32, #tpu.memory_space<vmem>>, vector<16x16xf32>
    tpu.vector_store %arg5[%c64_15, %c64_16], %10 {strides = array<i32>} : memref<128x128xf32, #tpu.memory_space<vmem>>, vector<16x16xf32>,
    %c80 = arith.constant 80 : index
    %c0_17 = arith.constant 0 : index
    %12 = vector.load %arg2[%c80, %c0_17] : memref<128x16xf32, #tpu.memory_space<vmem>>, vector<16x16xf32>
    %c80_18 = arith.constant 80 : index
    %c80_19 = arith.constant 80 : index
    %13 = vector.load %arg5[%c80_18, %c80_19] : memref<128x128xf32, #tpu.memory_space<vmem>>, vector<16x16xf32>
    tpu.vector_store %arg5[%c80_18, %c80_19], %12 {strides = array<i32>} : memref<128x128xf32, #tpu.memory_space<vmem>>, vector<16x16xf32>,
    %c96 = arith.constant 96 : index
    %c0_20 = arith.constant 0 : index
    %14 = vector.load %arg2[%c96, %c0_20] : memref<128x16xf32, #tpu.memory_space<vmem>>, vector<16x16xf32>
    %c96_21 = arith.constant 96 : index
    %c96_22 = arith.constant 96 : index
    %15 = vector.load %arg5[%c96_21, %c96_22] : memref<128x128xf32, #tpu.memory_space<vmem>>, vector<16x16xf32>
    tpu.vector_store %arg5[%c96_21, %c96_22], %14 {strides = array<i32>} : memref<128x128xf32, #tpu.memory_space<vmem>>, vector<16x16xf32>,
    %c112 = arith.constant 112 : index
    %c0_23 = arith.constant 0 : index
    %16 = vector.load %arg2[%c112, %c0_23] : memref<128x16xf32, #tpu.memory_space<vmem>>, vector<16x16xf32>
    %c112_24 = arith.constant 112 : index
    %c112_25 = arith.constant 112 : index
    %17 = vector.load %arg5[%c112_24, %c112_25] : memref<128x128xf32, #tpu.memory_space<vmem>>, vector<16x16xf32>
    tpu.vector_store %arg5[%c112_24, %c112_25], %16 {strides = array<i32>} : memref<128x128xf32, #tpu.memory_space<vmem>>, vector<16x16xf32>,
    %c0_26 = arith.constant 0 : index
    %c0_27 = arith.constant 0 : index
    %18 = vector.load %arg1[%c0_26, %c0_27] : memref<16x128xf32, #tpu.memory_space<vmem>>, vector<16x128xf32>
    %c0_28 = arith.constant 0 : index
    %c0_29 = arith.constant 0 : index
    %19 = vector.load %arg3[%c0_28, %c0_29] : memref<1x128xf32, #tpu.memory_space<vmem>>, vector<1x128xf32>
    %20 = vector.broadcast %19 : vector<1x128xf32> to vector<16x128xf32>
    %21 = arith.mulf %18, %20 : vector<16x128xf32>
    %c0_30 = arith.constant 0 : index
    %c0_31 = arith.constant 0 : index
    %22 = vector.load %arg5[%c0_30, %c0_31] : memref<128x128xf32, #tpu.memory_space<vmem>>, vector<128x128xf32>
    %cst_32 = arith.constant dense<0.000000e+00> : vector<16x128xf32>
    %23 = tpu.matmul %21, %22, %cst_32 {dimension_numbers = #tpu.dot_dimension_numbers<[1], [0], [0], [1], [0, 0, 1, 1], [], []>} : vector<16x128xf32>, vector<128x128xf32>, vector<16x128xf32> -> vector<16x128xf32>
    %c0_33 = arith.constant 0 : index
    %c0_34 = arith.constant 0 : index
    %24 = vector.load %arg4[%c0_33, %c0_34] : memref<16x128xf32, #tpu.memory_space<vmem>>, vector<16x128xf32>
    tpu.vector_store %arg4[%c0_33, %c0_34], %23 {strides = array<i32>} : memref<16x128xf32, #tpu.memory_space<vmem>>, vector<16x128xf32>,
    return
  }
  func.func @transform_0(%arg0: i32) -> (i32, i32) {
    %c0_i32 = arith.constant 0 : i32
    %c0_i32_0 = arith.constant 0 : i32
    %c0_i32_1 = arith.constant 0 : i32
    return %c0_i32, %c0_i32_0 : i32, i32
  }
  func.func @transform_1(%arg0: i32) -> (i32, i32) {
    %c0_i32 = arith.constant 0 : i32
    %c0_i32_0 = arith.constant 0 : i32
    %c0_i32_1 = arith.constant 0 : i32
    return %c0_i32, %c0_i32_0 : i32, i32
  }
  func.func @transform_2(%arg0: i32) -> (i32, i32) {
    %c0_i32 = arith.constant 0 : i32
    %c0_i32_0 = arith.constant 0 : i32
    %c0_i32_1 = arith.constant 0 : i32
    return %c0_i32, %c0_i32_0 : i32, i32
  }
  func.func @transform_3(%arg0: i32) -> (i32, i32) {
    %c0_i32 = arith.constant 0 : i32
    %c0_i32_0 = arith.constant 0 : i32
    %c0_i32_1 = arith.constant 0 : i32
    return %c0_i32, %c0_i32_0 : i32, i32
  }
}

</mosaic_0001>

<bundles_post_ra>
// kernel: custom-call.8
= control target key start
LH: loop header
LB: loop body
LE: loop exit
PB: predicated region body
PF: predicated region fallthrough
CT: control target
= control target key end

     0   :  { %s2361_s30 = smov [#allocation0]   ;;  %s2721_s0 = inlined_call_operand.vmem [shape: f32[8,8], index: 0, kind: input, shape index: {}]   ;;  %s2722_s1 = inlined_call_operand.vmem [shape: f32[8,8], index: 1, kind: input, shape index: {}]   ;;  %s2723_s2 = inlined_call_operand.vmem [shape: f32[8,8], index: 2, kind: input, shape index: {}]   ;;  %s2724_s3 = inlined_call_operand.vmem [shape: f32[8,8], index: 3, kind: input, shape index: {}]   ;;  %s2725_s4 = inlined_call_operand.vmem [shape: f32[8], index: 4, kind: output, shape index: {0}]   ;;  %s2726_s5 = inlined_call_operand.vmem [shape: f32[8], index: 5, kind: output, shape index: {1}]   ;;  %s2727_s6 = inlined_call_operand.vmem [shape: f32[8,8], index: 6, kind: output, shape index: {2}]   ;;  %s2728_s7 = inlined_call_operand.vmem [shape: f32[8,8], index: 7, kind: output, shape index: {3}]   ;;  %s2729_s8 = inlined_call_operand.vmem [shape: f32[8,8], index: 8, kind: output, shape index: {4}]   ;;  %s2730_s9 = inlined_call_operand.vmem [shape: f32[8,8], index: 9, kind: output, shape index: {5}]  }
   0x1   :  { %s2365_s12 = smov %s2721_s0  }
   0x2 LB: > { %v54_v0 = vld [vmem:[%s2367_s12] sm:$0xff]  ;;  %s56_s12 = scalar_lea.vmem %s2367_s12, 8   ;;  %s2367_s12 = sphi %s2365_s12, %s56_s12   ;;  %s2363_s30 = sphi %s2361_s30, %s57_s30  }
   0x3   : > { %55 = vst [vmem:[%s2363_s30] sm:$0xff] %v54_v0  ;;  %s57_s30 = scalar_lea.vmem %s2363_s30, 8   ;;  %p51_p0 = scmp.gt.s32.totalorder %s56_s12, %s2721_s0 }
   0x4   :  { %s2369_s15 = smov (%p51_p0), [#allocation1]   ;;  %s2373_s18 = smov (%p51_p0), %s2722_s1  }
   0x5   :  { %53 = sbr.rel (!%p51_p0) target bundleno = 2 (0x2), region = 358 }
   0xa LB: > { %v110_v1 = vld [vmem:[%s2375_s18] sm:$0xff]  ;;  %s112_s18 = scalar_lea.vmem %s2375_s18, 8   ;;  %s2375_s18 = sphi %s2373_s18, %s112_s18   ;;  %s2371_s15 = sphi %s2369_s15, %s113_s15  }
   0xb   : > { %111 = vst [vmem:[%s2371_s15] sm:$0xff] %v110_v1  ;;  %s113_s15 = scalar_lea.vmem %s2371_s15, 8   ;;  %p107_p1 = scmp.gt.s32.totalorder %s112_s18, %s2722_s1 }
   0xc   :  { %s2377_s0 = smov (%p107_p1), [#allocation2]   ;;  %s2381_s23 = smov (%p107_p1), %s2723_s2  }
   0xd   :  { %109 = sbr.rel (!%p107_p1) target bundleno = 10 (0xa), region = 380 }
  0x12 LB: > { %v166_v2 = vld [vmem:[%s2383_s23] sm:$0xff]  ;;  %s168_s23 = scalar_lea.vmem %s2383_s23, 8   ;;  %s2383_s23 = sphi %s2381_s23, %s168_s23   ;;  %s2379_s0 = sphi %s2377_s0, %s169_s0  }
  0x13   : > { %167 = vst [vmem:[%s2379_s0] sm:$0xff] %v166_v2  ;;  %s169_s0 = scalar_lea.vmem %s2379_s0, 8   ;;  %p163_p2 = scmp.gt.s32.totalorder %s168_s23, %s2723_s2 }
  0x14   :  { %s2385_s1 = smov (%p163_p2), [#allocation3]   ;;  %s2389_s28 = smov (%p163_p2), %s2724_s3  }
  0x15   :  { %165 = sbr.rel (!%p163_p2) target bundleno = 18 (0x12), region = 402 }
  0x1a LB: > { %v222_v3 = vld [vmem:[%s2391_s28] sm:$0xff]  ;;  %s224_s28 = scalar_lea.vmem %s2391_s28, 8   ;;  %s2391_s28 = sphi %s2389_s28, %s224_s28   ;;  %s2387_s1 = sphi %s2385_s1, %s225_s1  }
  0x1b   : > { %223 = vst [vmem:[%s2387_s1] sm:$0xff] %v222_v3  ;;  %s225_s1 = scalar_lea.vmem %s2387_s1, 8   ;;  %p219_p3 = scmp.gt.s32.totalorder %s224_s28, %s2724_s3 }
  0x1c   :  { %s235_s2 = smov (%p219_p3), [#allocation12]  ;;  %v236_v4 = vld [vmem:[#allocation0] sm:$0xff] (%p219_p3)  ;;  %s238_s10 = smov (%p219_p3), [#allocation13]  ;;  %v239_v5 = vld [vmem:[#allocation1] sm:$0xff] (%p219_p3)  ;;  %v242_v6 = vld [vmem:[#allocation2] sm:$0xff] (%p219_p3)  ;;  %v252_v7 = vlaneseq (%p219_p3)  ;;  %v2433_v11 = vmov (%p219_p3), 0.0  }
  0x1d   :  { %221 = sbr.rel (!%p219_p3) target bundleno = 26 (0x1a), region = 424  ;;  %237 = vst [vmem:[%s235_s2] sm:$0xff] (%p219_p3), %v236_v4  ;;  %s241_s11 = smov (%p219_p3), [#allocation14] }
  0x1e   :  { %s244_s12 = smov (%p219_p3), [#allocation15]  ;;  %240 = vst [vmem:[%s238_s10] sm:$0xff] (%p219_p3), %v239_v5  ;;  %v2510_v9 = vand.u32 (%p219_p3), 127, %v252_v7  ;;  %v2512_v10 = vshrl.u32 (%p219_p3), %v252_v7, 7  ;;  %s251_s3 = smov (%p219_p3), [#allocation8] }
  0x1f   :  { %243 = vst [vmem:[%s241_s11] sm:$0xff] (%p219_p3), %v242_v6  ;;  %s264_s13 = smov (%p219_p3), [#allocation11]  ;;  %s1387_s14 = smov (%p219_p3), [#allocation12] }
  0x20   :  { %247 = vst [vmem:[#allocation8] sm:$0xff] (%p219_p3), %v2433_v11  ;;  %v254_v9 = vmov (%p219_p3), %v2510_v9  ;;  %v257_v10 = vmov (%p219_p3), %v2512_v10  ;;  %vm1391_vm2 = vcmp.lt.s32.totalorder (%p219_p3), %v2510_v9, 8  ;;  %s1404_s15 = smov (%p219_p3), [#allocation13]  ;;  %s1421_s16 = smov (%p219_p3), [#allocation14] }
  0x21   :  { %248 = vst [vmem:[#allocation9] sm:$0xff] (%p219_p3), %v2433_v11  ;;  %vm261_vm0 = vcmp.eq.s32.totalorder (%p219_p3), %v257_v10, %v254_v9  ;;  %v267_v9 = vmov (%p219_p3), %v2510_v9  ;;  %v270_v10 = vmov (%p219_p3), %v2512_v10  ;;  %s1438_s17 = smov (%p219_p3), [#allocation15] }
  0x22   :  { %v245_v8 = vld [vmem:[#allocation3] sm:$0xff]  ;;  %249 = vst [vmem:[#allocation10] sm:$0xff] %v2433_v11  ;;  %vm274_vm1 = vcmp.eq.s32.totalorder %v270_v10, %v267_v9  ;;  %v1383_v9 = vmov %v2510_v9  ;;  %v1386_v10 = vmov %v2512_v10 }
  0x23   :  { %246 = vst [vmem:[%s244_s12] sm:$0xff] %v245_v8  ;;  %v1400_v9 = vmov %v2510_v9  ;;  %v1403_v10 = vmov %v2512_v10  ;;  %vm1396_vm3 = vcmp.eq.s32.totalorder %v1386_v10, %v1383_v9 }
  0x24   :  { %250 = vst [vmem:[#allocation11] sm:$0xff] %v2433_v11  ;;  %v1393_v16 = vld [vmem:[%s1387_s14] sm:$0xff]  ;;  %v1417_v9 = vmov %v2510_v9  ;;  %v1420_v10 = vmov %v2512_v10 }
  0x25   :  { %v1410_v17 = vld [vmem:[%s1404_s15] sm:$0xff]  ;;  %v1394_v18 = vsel %vm1391_vm2, %v1393_v16, 0.0  ;;  %v1434_v9 = vmov %v2510_v9  ;;  %v1437_v10 = vmov %v2512_v10 }
  0x26   :  { %v1411_v19 = vsel %vm1391_vm2, %v1410_v17, 0.0  ;;  %v1427_v20 = vld [vmem:[%s1421_s16] sm:$0xff]  ;;  %v1395_v22 = vmul.f32 %v1394_v18, %v1394_v18  ;;  %vm1447_vm4 = vcmp.eq.s32.totalorder %v1437_v10, %v1434_v9 }
  0x27   :  { %v258_v12 = vld [vmem:[%s251_s3] sm:$0xff]  ;;  %v1412_v23 = vmul.f32 %v1411_v19, %v1411_v19  ;;  %v1428_v24 = vsel %vm1391_vm2, %v1427_v20, 0.0 }
  0x28   :  { %v262_v13 = vsel %vm261_vm0, 1.0, %v258_v12  ;;  %v1429_v26 = vmul.f32 %v1428_v24, %v1428_v24  ;;  %v1397_v29 = vsel %vm1396_vm3, 0.0, %v1395_v22 }
  0x29   :  { %263 = vst [vmem:[%s251_s3] sm:$0xff] %v262_v13  ;;  %v1414_v27 = vadd.f32 %v1412_v23, %v1395_v22  ;;  %v1413_v31 = vadd.f32 %v1412_v23, %v1397_v29 }
  0x2a   :  { %v1444_v21 = vld [vmem:[%s1438_s17] sm:$0xff] }
  0x2b   :  { %v271_v14 = vld [vmem:[%s264_s13] sm:$0xff]  ;;  %v1445_v25 = vsel %vm1391_vm2, %v1444_v21, 0.0  ;;  %v1431_v30 = vadd.f32 %v1429_v26, %v1414_v27  ;;  %v1430_v33 = vadd.f32 %v1429_v26, %v1413_v31 }
  0x2c   :  { %v275_v15 = vsel %vm274_vm1, 1.0, %v271_v14  ;;  %v1446_v28 = vmul.f32 %v1445_v25, %v1445_v25 }
  0x2d   :  { %276 = vst [vmem:[%s264_s13] sm:$0xff] %v275_v15 }
  0x2e   :  { %v1450_v32 = vadd.f32 %v1446_v28, %v1431_v30  ;;  %v1448_v34 = vsel %vm1447_vm4, 0.0, %v1446_v28 }
  0x2f   :  { %v1449_v35 = vadd.f32 %v1448_v34, %v1430_v33 }
  0x30   :  { %1451 = vadd.xlane.f32.xlu0 %v1450_v32 }
  0x38   :  { %1459 = vadd.xlane.f32.xlu0 %v1449_v35 }
  0xa3   :  { %v1452_v36 = vpop.xlane.xlu0 %1451 }
  0xa4   :  { %v1453_v37 = vrot.slane %v1452_v36, 4 }
  0xa6   :  { %v1454_v38 = vadd.f32 %v1453_v37, %v1452_v36 }
  0xa8   :  { %v1455_v39 = vrot.slane %v1454_v38, 2 }
  0xaa   :  { %v1456_v43 = vadd.f32 %v1455_v39, %v1454_v38 }
  0xab   :  { %v1460_v40 = vpop.xlane.xlu0 %1459 }
  0xac   :  { %v1461_v41 = vrot.slane %v1460_v40, 4  ;;  %v1457_v46 = vrot.slane %v1456_v43, 1 }
  0xae   :  { %v1462_v42 = vadd.f32 %v1461_v41, %v1460_v40  ;;  %v1458_v49 = vadd.f32 %v1457_v46, %v1456_v43 }
  0xb0   :  { %v1463_v44 = vrot.slane %v1462_v42, 2 }
  0xb2   :  { %v1464_v45 = vadd.f32 %v1463_v44, %v1462_v42 }
  0xb4   :  { %v1465_v47 = vrot.slane %v1464_v45, 1 }
  0xb6   :  { %v1466_v48 = vadd.f32 %v1465_v47, %v1464_v45 }
  0xb8   :  { %1642 = vpush %v1466_v48 }
  0xb9   :  { %1644 = vpush %v1458_v49 }
  0xe9   :  { %s1643_s18 = spop %1642 }
  0xea   :  { %s1645_s19 = spop %1644 }
  0xeb   :  { %s1469_s20 = smul.f32 1e-10, %s1645_s19 }
  0xed   :  { %p1470_p4 = scmp.le.f32.partialorder %s1643_s18, %s1469_s20 }
  0xee   :  { %s2535_s0 = smov (!%p1470_p4), 0  }
  0xef   :  { %1473 = sbr.rel (%p1470_p4) target bundleno = 897 (0x381), region = 440 }
  0xf4 LB: > { %s2540_s21 = smov 0   ;;  %s2395_s0 = sphi %s2535_s0, %s2731_s0  }
  0xf5 LB: >> { %s381_s22 = smov [#allocation12]  ;;  %v385_v9 = vmov %v2510_v9  ;;  %v388_v10 = vmov %v2512_v10  ;;  %s401_s23 = smov [#allocation13]  ;;  %s2399_s21 = sphi %s2540_s21, %s380_s21  }
  0xf6   : >> { %v405_v9 = vmov %v2510_v9  ;;  %v408_v10 = vmov %v2512_v10  ;;  %v389_v50 = vld [vmem:[%s381_s22] sm:$0xff]  ;;  %vm392_vm5 = vcmp.eq.s32.totalorder %v388_v10, %v385_v9  ;;  %s421_s24 = smov [#allocation15]  ;;  %s382_s25 = smov [#allocation16] }
  0xf7   : >> { %vm412_vm6 = vcmp.eq.s32.totalorder %v408_v10, %v405_v9  ;;  %v425_v9 = vmov %v2510_v9  ;;  %v428_v10 = vmov %v2512_v10  ;;  %v393_v51 = vsel %vm392_vm5, %v389_v50, 0.0  ;;  %v409_v52 = vld [vmem:[%s401_s23] sm:$0xff]  ;;  %s402_s1 = smov [#allocation17]  ;;  %s422_s26 = smov [#allocation18] }
  0xf8   : >> { %vm432_vm7 = vcmp.eq.s32.totalorder %v428_v10, %v425_v9  ;;  %v394_v53 = vrot.slane %v393_v51, 4  ;;  %v413_v54 = vsel %vm412_vm6, %v409_v52, 0.0  ;;  %v429_v55 = vld [vmem:[%s421_s24] sm:$0xff]  ;;  %s445_s27 = smov [#allocation17]  ;;  %s443_s28 = smov [#allocation16]  ;;  %v534_v9 = vmov %v2510_v9 }
  0xf9   : >> { %v414_v56 = vrot.slane %v413_v54, 4  ;;  %v433_v57 = vsel %vm432_vm7, %v429_v55, 0.0  ;;  %s447_s29 = smov [#allocation18]  ;;  %s522_s30 = smov [#allocation19]  ;;  %v537_v10 = vmov %v2512_v10 }
  0xfa   : >> { %v395_v58 = vadd.f32 %v394_v53, %v393_v51  ;;  %v434_v59 = vrot.slane %v433_v57, 4  ;;  %s524_s2 = smov [#allocation20]  ;;  %s441_s10 = smov [#allocation21] }
  0xfb   : >> { %v415_v60 = vadd.f32 %v414_v56, %v413_v54  ;;  %s442_s11 = smov [#allocation22]  ;;  %s526_s10 = smov %s441_s10 }
  0xfc   : >> { %v396_v61 = vrot.slane %v395_v58, 2  ;;  %v435_v62 = vadd.f32 %v434_v59, %v433_v57  ;;  %s528_s11 = smov %s442_s11  ;;  %s530_s12 = smov [#allocation21] }
  0xfd   : >> { %v416_v63 = vrot.slane %v415_v60, 2  ;;  %s545_s3 = smov [#allocation22]  ;;  %s543_s13 = smov [#allocation23] }
  0xfe   : >> { %v397_v0 = vadd.f32 %v396_v61, %v395_v58  ;;  %v436_v1 = vrot.slane %v435_v62, 2  ;;  %s558_s14 = smov [#allocation24]  ;;  %s560_s15 = smov [#allocation23] }
  0xff   : >> { %v417_v2 = vadd.f32 %v416_v63, %v415_v60  ;;  %s2560_s16 = smov [#allocation12]  ;;  %s2562_s17 = smov [#allocation13] }
 0x100   : >> { %v398_v3 = vrot.slane %v397_v0, 1  ;;  %v437_v4 = vadd.f32 %v436_v1, %v435_v62  ;;  %s2564_s18 = smov [#allocation14]  ;;  %s784_s19 = smov [#allocation23] }
 0x101   : >> { %v418_v5 = vrot.slane %v417_v2, 1  ;;  %s2566_s20 = smov [#allocation8]  ;;  %s2568_s22 = smov [#allocation9] }
 0x102   : >> { %v399_v6 = vadd.f32 %v398_v3, %v397_v0  ;;  %v438_v7 = vrot.slane %v437_v4, 1  ;;  %s2570_s23 = smov [#allocation15]  ;;  %s2572_s24 = smov [#allocation10] }
 0x103   : >> { %v419_v8 = vadd.f32 %v418_v5, %v417_v2  ;;  %s380_s21 = sadd.s32 1, %s2399_s21  }
 0x104   : >> { %400 = vst [vmem:[%s382_s25] sm:$0x1] %v399_v6  ;;  %v439_v11 = vadd.f32 %v438_v7, %v437_v4  ;;  %s562_s25 = smov [#allocation24]  ;;  %p377_p5 = scmp.ge.s32.totalorder %s380_s21, 15  }
 0x105   : >> { %420 = vst [vmem:[%s402_s1] sm:$0x1] %v419_v8  ;;  %s786_s1 = smov [#allocation24] }
 0x106   : >> { %440 = vst [vmem:[%s422_s26] sm:$0x1] %v439_v11  ;;  %s2576_s26 = smov [#allocation11] }
 0x10b   : >> { %v444_v19 = vld [vmem:[%s443_s28] sm:$0xff]  ;;  %s590_s28 = smov [#allocation22] }
 0x10c   : >> { %v2551_v12 = vld [vmem:[%s445_s27] sm:$0xff]  ;;  %v498_v43 = vand.u32 2147483647, %v444_v19  ;;  %s588_s27 = smov [#allocation21] }
 0x10d   : >> { %v450_v13 = vmul.f32 2.0, %v2551_v12  ;;  %v448_v20 = vld [vmem:[%s447_s29] sm:$0xff]  ;;  %v499_v51 = vand.u32 2147483647, %v2551_v12  ;;  %s2590_s29 = smov [#allocation14] }
 0x10e   : >> { %v449_v23 = vsub.f32 %v448_v20, %v444_v19  ;;  %v500_v44 = vand.u32 2147483647, %v448_v20 }
 0x10f   : >> { %2121 = vrcp.f32 %v450_v13  ;;  %v462_v16 = vand.u32 2147483648, %v450_v13  ;;  %vm456_vm8 = vweird.f32 %v450_v13  ;;  %v460_v18 = vand.u32 2147483647, %v450_v13 }
 0x110   : >> { %v501_v46 = vmin.f32 %v498_v43, %v500_v44 }
 0x111   : >> { %v463_v22 = vor.u32 1.1754944e-38, %v462_v16  ;;  %vm461_vm11 = vcmp.eq.f32.partialorder %v460_v18, 8.507059e+37  ;;  %v569_v16 = vld [vmem:[%s2562_s17] sm:$0xff] }
 0x112   : >> { %v502_v52 = vmul.f32 1.1920929e-08, %v501_v46 }
 0x114   : >> { %vm503_vm4 = vcmp.le.f32.partialorder %v499_v51, %v502_v52 }
 0x115   : >> { %v2122_v14 = vpop.eup %2121 }
 0x116   : >> { %v452_v15 = vmul.f32 %v2122_v14, %v450_v13  ;;  %vm457_vm9 = vweird.f32 %v2122_v14 }
 0x117   : >> { %vm458_vm10 = vmor %vm456_vm8, %vm457_vm9  ;;  %vm539_vm8 = vcmp.eq.s32.totalorder %v537_v10, %v534_v9  ;;  %v549_v9 = vmov %v2510_v9  ;;  %v552_v10 = vmov %v2512_v10 }
 0x118   : >> { %v453_v17 = vsub.f32 1.0, %v452_v15  ;;  %vm554_vm9 = vcmp.eq.s32.totalorder %v552_v10, %v549_v9  ;;  %v620_v9 = vmov %v2510_v9 }
 0x119   : >> { %v661_v9 = vmov %v2510_v9 }
 0x11a   : >> { %v454_v21 = vmul.f32 %v2122_v14, %v453_v17  ;;  %v570_v17 = vld [vmem:[%s2564_s18] sm:$0xff]  ;;  %v647_v9 = vmov %v2510_v9 }
 0x11c   : >> { %v455_v24 = vadd.f32 %v2122_v14, %v454_v21 }
 0x11e   : >> { %v459_v25 = vsel %vm458_vm10, %v2122_v14, %v455_v24  ;;  %v794_v24 = vld [vmem:[%s2572_s24] sm:$0xff]  ;;  %vm744_vm10 = vcmp.eq.s32.totalorder %v2512_v10, 0 }
 0x11f   : >> { %v464_v26 = vsel %vm461_vm11, %v463_v22, %v459_v25  ;;  %v568_v22 = vld [vmem:[%s2560_s16] sm:$0xff]  ;;  %vm756_vm11 = vcmp.eq.s32.totalorder %v2512_v10, 7  ;;  %v623_v10 = vmov %v2512_v10 }
 0x120   : >> { %v465_v27 = vmul.f32 %v464_v26, %v449_v23  ;;  %v571_v23 = vld [vmem:[%s2570_s23] sm:$0xff]  ;;  %v664_v10 = vmov %v2512_v10 }
 0x121   : >> { %v650_v10 = vmov %v2512_v10 }
 0x122   : >> { %v467_v28 = vmul.f32 %v465_v27, %v465_v27  ;;  %vm466_vm14 = vcmp.ge.f32.partialorder %v465_v27, 0.0 }
 0x124   : >> { %v468_v29 = vadd.f32 1.0, %v467_v28 }
 0x126   : >> { %2123 = vrsqrt.f32 %v468_v29  ;;  %vm476_vm12 = vcmp.eq.f32.partialorder %v468_v29, inf  ;;  %v479_v36 = vand.u32 2147483648, %v468_v29  ;;  %vm478_vm13 = vcmp.eq.f32.partialorder %v468_v29, 0.0 }
 0x12c   : >> { %v2124_v30 = vpop.eup %2123 }
 0x12d   : >> { %v470_v31 = vmul.f32 %v2124_v30, %v468_v29 }
 0x12f   : >> { %v471_v32 = vmul.f32 %v2124_v30, %v470_v31 }
 0x131   : >> { %v472_v33 = vmul.f32 0.5, %v471_v32 }
 0x133   : >> { %v473_v34 = vsub.f32 1.5, %v472_v33 }
 0x135   : >> { %v474_v35 = vmul.f32 %v2124_v30, %v473_v34 }
 0x137   : >> { %v475_v37 = vmul.f32 %v474_v35, %v468_v29 }
 0x139   : >> { %v477_v38 = vsel %vm476_vm12, %v468_v29, %v475_v37  ;;  %v795_v29 = vld [vmem:[%s2576_s26] sm:$0xff]  ;;  %vm628_vm12 = vcmp.eq.s32.totalorder %v623_v10, %v620_v9  ;;  %v634_v9 = vmov %v2510_v9  ;;  %v637_v10 = vmov %v2512_v10 }
 0x13a   : >> { %v480_v39 = vsel %vm478_vm13, %v479_v36, %v477_v38  ;;  %vm669_vm13 = vcmp.eq.s32.totalorder %v664_v10, %v661_v9 }
 0x13b   : >> { %v481_v40 = vxor.u32 2147483648, %v480_v39 }
 0x13d   : >> { %v482_v41 = vsel %vm466_vm14, %v480_v39, %v481_v40  ;;  %vm654_vm14 = vcmp.eq.s32.totalorder %v650_v10, %v647_v9 }
 0x13e   : >> { %v483_v42 = vadd.f32 %v482_v41, %v465_v27 }
 0x140   : >> { %2125 = vrcp.f32 %v483_v42  ;;  %v495_v48 = vand.u32 2147483648, %v483_v42  ;;  %vm489_vm15 = vweird.f32 %v483_v42  ;;  %v493_v50 = vand.u32 2147483647, %v483_v42 }
 0x142   : >> { %v496_v54 = vor.u32 1.1754944e-38, %v495_v48  ;;  %vm494_vm3 = vcmp.eq.f32.partialorder %v493_v50, 8.507059e+37 }
 0x146   : >> { %v2126_v45 = vpop.eup %2125 }
 0x147   : >> { %v485_v47 = vmul.f32 %v2126_v45, %v483_v42  ;;  %vm490_vm0 = vweird.f32 %v2126_v45 }
 0x148   : >> { %vm491_vm1 = vmor %vm489_vm15, %vm490_vm0  ;;  %vm641_vm15 = vcmp.eq.s32.totalorder %v637_v10, %v634_v9  ;;  %vm700_vm0 = vcmp.eq.s32.totalorder %v2510_v9, 7  ;;  %v284_v10 = vmov (%p377_p5), %v2512_v10 }
 0x149   : >> { %v486_v49 = vsub.f32 1.0, %v485_v47 }
 0x14b   : >> { %v487_v53 = vmul.f32 %v2126_v45, %v486_v49 }
 0x14d   : >> { %v488_v55 = vadd.f32 %v2126_v45, %v487_v53 }
 0x14f   : >> { %v492_v56 = vsel %vm491_vm1, %v2126_v45, %v488_v55  ;;  %vm683_vm1 = vcmp.eq.s32.totalorder %v2510_v9, 0 }
 0x150   : >> { %v497_v57 = vsel %vm494_vm3, %v496_v54, %v492_v56  ;;  %vm687_vm3 = vcmp.eq.s32.totalorder %v2510_v9, 1  ;;  %v281_v9 = vmov (%p377_p5), %v2510_v9 }
 0x151   : >> { %v504_v58 = vsel %vm503_vm4, 0.0, %v497_v57  ;;  %vm296_vm4 = vcmp.eq.s32.totalorder (%p377_p5), %v284_v10, %v281_v9  ;;  %v300_v9 = vmov (%p377_p5), %v2510_v9  ;;  %v303_v10 = vmov (%p377_p5), %v2512_v10 }
 0x152   : >> { %v505_v59 = vmul.f32 %v504_v58, %v504_v58  ;;  %v518_v60 = vmul.f32 %v504_v58, %v2551_v12  ;;  %v317_v9 = vmov (%p377_p5), %v2510_v9  ;;  %v320_v10 = vmov (%p377_p5), %v2512_v10 }
 0x153   : > { %v334_v9 = vmov (%p377_p5), %v2510_v9  ;;  %v337_v10 = vmov (%p377_p5), %v2512_v10 }
 0x154   : >> { %v506_v61 = vadd.f32 1.0, %v505_v59  ;;  %v519_v62 = vsub.f32 %v444_v19, %v518_v60  ;;  %v521_v63 = vadd.f32 %v518_v60, %v448_v20  ;;  %v792_v19 = vld [vmem:[%s2566_s20] sm:$0xff] }
 0x155   : >> { %v793_v20 = vld [vmem:[%s2568_s22] sm:$0xff] }
 0x156   : >> { %2127 = vrsqrt.f32 %v506_v61  ;;  %523 = vst [vmem:[%s522_s30] sm:$0xff] %v519_v62  ;;  %vm513_vm5 = vweird.f32 %v506_v61  ;;  %s2592_s30 = smov [#allocation13] }
 0x157   : >> { %525 = vst [vmem:[%s524_s2] sm:$0xff] %v521_v63  ;;  %s812_s2 = smov [#allocation8] }
 0x15c   : >> { %v2128_v0 = vpop.eup %2127 }
 0x15d   : >> { %v508_v1 = vmul.f32 %v2128_v0, %v506_v61  ;;  %vm514_vm6 = vweird.f32 %v2128_v0 }
 0x15e   : >> { %vm515_vm7 = vmor %vm513_vm5, %vm514_vm6  ;;  %vm349_vm5 = vcmp.eq.s32.totalorder (%p377_p5), %v337_v10, %v334_v9 }
 0x15f   : >> { %v509_v2 = vmul.f32 %v2128_v0, %v508_v1 }
 0x161   : >> { %v510_v3 = vmul.f32 0.5, %v509_v2 }
 0x163   : >> { %v511_v4 = vsub.f32 1.5, %v510_v3 }
 0x165   : >> { %v512_v5 = vmul.f32 %v2128_v0, %v511_v4 }
 0x167   : >> { %v516_v6 = vsel %vm515_vm7, %v2128_v0, %v512_v5 }
 0x168   : >> { %527 = vst [vmem:[%s526_s10] sm:$0xff] %v516_v6  ;;  %v517_v7 = vmul.f32 %v516_v6, %v504_v58  ;;  %s813_s10 = smov [#allocation10] }
 0x16a   : >> { %529 = vst [vmem:[%s528_s11] sm:$0xff] %v517_v7  ;;  %s2596_s11 = smov [#allocation9] }
 0x16f   : >> { %v531_v8 = vld [vmem:[%s530_s12] ss:$0 sm:$0xff]  ;;  %s2598_s12 = smov [#allocation11] }
 0x170   : >> { %v540_v11 = vsel %vm539_vm8, %v531_v8, 0.0  ;;  %v589_v52 = vld [vmem:[%s588_s27] ss:$0 sm:$0xff]  ;;  %s737_s27 = smov [#allocation14] }
 0x171   : >> { %541 = vadd.xlane.f32.xlu0 %v540_v11  ;;  %v546_v12 = vld [vmem:[%s545_s3] ss:$0 sm:$0xff]  ;;  %s2603_s3 = smov [#allocation12] }
 0x172   : >> { %v555_v13 = vsel %vm554_vm9, %v546_v12, 0.0  ;;  %v591_v53 = vld [vmem:[%s590_s28] ss:$0 sm:$0xff]  ;;  %s736_s28 = smov [#allocation12] }
 0x179   : >> { %556 = vadd.xlane.f32.xlu0 %v555_v13 }
 0x1e4   : >> { %v542_v14 = vpop.xlane.xlu0 %541 }
 0x1e5   : >> { %544 = vst [vmem:[%s543_s13] sm:$0xff] %v542_v14  ;;  %s595_s13 = smov [#allocation15] }
 0x1ec   : >> { %v557_v15 = vpop.xlane.xlu0 %556  ;;  %v561_v18 = vld [vmem:[%s560_s15] sm:$0xff]  ;;  %s658_s15 = smov [#allocation20] }
 0x1ed   : >> { %559 = vst [vmem:[%s558_s14] sm:$0xff] %v557_v15  ;;  %v785_v21 = vld [vmem:[%s784_s19] sm:$0xff]  ;;  %v575_v25 = vmul.f32 %v569_v16, %v561_v18  ;;  %v579_v26 = vmul.f32 %v570_v17, %v561_v18  ;;  %v572_v46 = vmul.f32 %v568_v22, %v561_v18  ;;  %v582_v48 = vmul.f32 %v571_v23, %v561_v18  ;;  %s617_s14 = smov [#allocation19]  ;;  %s631_s19 = smov [#allocation13] }
 0x1ee   : >> { %v796_v30 = vmul.f32 %v792_v19, %v785_v21  ;;  %v799_v31 = vmul.f32 %v793_v20, %v785_v21  ;;  %v803_v38 = vmul.f32 %v794_v24, %v785_v21  ;;  %v806_v42 = vmul.f32 %v795_v29, %v785_v21 }
 0x1f4   : >> { %v563_v27 = vld [vmem:[%s562_s25] sm:$0xff]  ;;  %s673_s25 = smov [#allocation13] }
 0x1f5   : >> { %v787_v28 = vld [vmem:[%s786_s1] sm:$0xff]  ;;  %v576_v32 = vmul.f32 %v571_v23, %v563_v27  ;;  %v578_v33 = vmul.f32 %v568_v22, %v563_v27  ;;  %v573_v39 = vmul.f32 %v570_v17, %v563_v27  ;;  %v581_v43 = vmul.f32 %v569_v16, %v563_v27  ;;  %s2435_s1 = smov 127  }
 0x1f6   : >> { %v797_v34 = vmul.f32 %v794_v24, %v787_v28  ;;  %v800_v35 = vmul.f32 %v795_v29, %v787_v28  ;;  %v802_v36 = vmul.f32 %v792_v19, %v787_v28  ;;  %v805_v37 = vmul.f32 %v793_v20, %v787_v28  ;;  %v624_v22 = vld [vmem:[%s617_s14] ss:$0 sm:$0xff] }
 0x1f7   : >> { %v577_v40 = vsub.f32 %v575_v25, %v576_v32  ;;  %v580_v41 = vadd.f32 %v579_v26, %v578_v33  ;;  %v574_v50 = vsub.f32 %v572_v46, %v573_v39  ;;  %v583_v51 = vadd.f32 %v582_v48, %v581_v43  ;;  %v665_v23 = vld [vmem:[%s658_s15] ss:$0 sm:$0xff] }
 0x1f8   : >> { %v798_v44 = vsub.f32 %v796_v30, %v797_v34  ;;  %v801_v45 = vsub.f32 %v799_v31, %v800_v35  ;;  %v804_v47 = vadd.f32 %v803_v38, %v802_v36  ;;  %v807_v49 = vadd.f32 %v806_v42, %v805_v37 }
 0x1f9   : >> { %585 = vst [vmem:[%s2562_s17] sm:$0xff] %v577_v40  ;;  %s657_s17 = smov [#allocation15] }
 0x1fa   : >> { %586 = vst [vmem:[%s2564_s18] sm:$0xff] %v580_v41  ;;  %s644_s18 = smov [#allocation14] }
 0x1fb   : >> { %808 = vst [vmem:[%s2566_s20] sm:$0xff] %v798_v44  ;;  %s2634_s20 = smov [#allocation12] }
 0x1fc   : >> { %809 = vst [vmem:[%s2568_s22] sm:$0xff] %v801_v45  ;;  %s2636_s22 = smov [#allocation15] }
 0x1fd   : >> { %810 = vst [vmem:[%s2572_s24] sm:$0xff] %v804_v47  ;;  %s2434_s24 = smov 1  }
 0x1fe   : >> { %811 = vst [vmem:[%s2576_s26] sm:$0xff] %v807_v49  ;;  %s2646_s26 = smov [#allocation13] }
 0x1ff   : >> { %584 = vst [vmem:[%s2560_s16] sm:$0xff] %v574_v50  ;;  %s616_s16 = smov [#allocation12] }
 0x200   : >> { %587 = vst [vmem:[%s2570_s23] sm:$0xff] %v583_v51  ;;  %v597_v55 = vld [vmem:[%s2592_s30] sm:$0xff]  ;;  %s2638_s23 = smov [#allocation14] }
 0x201   : >> { %v598_v54 = vld [vmem:[%s2590_s29] sm:$0xff]  ;;  %v601_v4 = vmul.f32 %v597_v55, %v591_v53  ;;  %v604_v12 = vmul.f32 %v597_v55, %v589_v52 }
 0x202   : >> { %v814_v56 = vld [vmem:[%s812_s2] ss:$0 sm:$0xff]  ;;  %v1613_v58 = vld [vmem:[%s812_s2 + $0x7] ss:$0 sm:$0xff]  ;;  %v609_v7 = vmul.f32 %v598_v54, %v591_v53  ;;  %v606_v8 = vmul.f32 %v598_v54, %v589_v52 }
 0x203   : >> { %v1612_v57 = vld [vmem:[%s812_s2 - $0x1] sm:$0xfe]  ;;  %v1617_v62 = vld [vmem:[%s2596_s11 + $0x7] ss:$0 sm:$0xff] }
 0x204   : >> { %v821_v59 = vsel %vm744_vm10, %v814_v56, %v1612_v57  ;;  %v838_v60 = vld [vmem:[%s2596_s11] ss:$0 sm:$0xff]  ;;  %v1615_v0 = vld [vmem:[%s813_s10 + $0x1] sm:$0x7f] }
 0x205   : >> { %v1616_v61 = vld [vmem:[%s2596_s11 - $0x1] sm:$0xfe]  ;;  %824 = vst [vmem:[%s812_s2] sm:$0xff] %v821_v59  ;;  %v833_v2 = vsel %vm756_vm11, %v1613_v58, %v1615_v0 }
 0x206   : >> { %v825_v63 = vld [vmem:[%s813_s10] ss:$0 sm:$0xff]  ;;  %v845_v1 = vsel %vm744_vm10, %v838_v60, %v1616_v61  ;;  %v1619_v3 = vld [vmem:[%s2598_s12 + $0x1] sm:$0x7f] }
 0x207   : >> { %1614 = vst [vmem:[%s812_s2 + $0x1] sm:$0x1] %v825_v63  ;;  %v849_v5 = vld [vmem:[%s2598_s12] ss:$0 sm:$0xff]  ;;  %v857_v6 = vsel %vm756_vm11, %v1617_v62, %v1619_v3  ;;  %s285_s2 = smov (%p377_p5), [#allocation12] }
 0x208   : >> { %835 = vst [vmem:[%s813_s10] sm:$0xff] %v833_v2  ;;  %v596_v11 = vld [vmem:[%s2603_s3] sm:$0xff]  ;;  %s304_s10 = smov (%p377_p5), [#allocation13] }
 0x209   : >> { %848 = vst [vmem:[%s2596_s11] sm:$0xff] %v845_v1  ;;  %v599_v13 = vld [vmem:[%s595_s13] sm:$0xff]  ;;  %v600_v14 = vmul.f32 %v596_v11, %v589_v52  ;;  %v603_v15 = vmul.f32 %v596_v11, %v591_v53 }
 0x20a   : >> { %1618 = vst [vmem:[%s2596_s11 + $0x1] sm:$0x1] %v849_v5  ;;  %v607_v16 = vmul.f32 %v599_v13, %v591_v53  ;;  %v610_v17 = vmul.f32 %v599_v13, %v589_v52  ;;  %s321_s11 = smov (%p377_p5), [#allocation14] }
 0x20b   : >> { %859 = vst [vmem:[%s2598_s12] sm:$0xff] %v857_v6  ;;  %v602_v18 = vsub.f32 %v600_v14, %v601_v4  ;;  %v605_v21 = vadd.f32 %v604_v12, %v603_v15  ;;  %s338_s12 = smov (%p377_p5), [#allocation15] }
 0x20c   : >> { %v611_v19 = vadd.f32 %v610_v17, %v609_v7  ;;  %v608_v20 = vsub.f32 %v606_v8, %v607_v16 }
 0x20d   : >> { %612 = vst [vmem:[%s2603_s3] sm:$0xff] %v602_v18 }
 0x20e   : >> { %615 = vst [vmem:[%s595_s13] sm:$0xff] %v611_v19 }
 0x20f   : >> { %614 = vst [vmem:[%s2590_s29] sm:$0xff] %v608_v20  ;;  %s761_s29 = smov [#allocation15] }
 0x210   : >> { %613 = vst [vmem:[%s2592_s30] sm:$0xff] %v605_v21  ;;  %s860_s30 = sadd.s32 (%p377_p5), 1, %s2395_s0  }
 0x211   : > { %p373_p6 = scmp.ge.s32.totalorder (%p377_p5), %s860_s30, 15  ;;  %s2731_s0 = smov (%p377_p5), %s860_s30 }
 0x214   : >> { %v625_v24 = vld [vmem:[%s616_s16] sm:$0xff] }
 0x215   : >> { %v666_v25 = vld [vmem:[%s657_s17] sm:$0xff]  ;;  %v629_v26 = vsel %vm628_vm12, %v624_v22, %v625_v24 }
 0x216   : >> { %v670_v27 = vsel %vm669_vm13, %v665_v23, %v666_v25  ;;  %v651_v28 = vld [vmem:[%s644_s18] sm:$0xff]  ;;  %630 = vst [vmem:[%s616_s16] sm:$0xff] %v629_v26 }
 0x217   : >> { %671 = vst [vmem:[%s657_s17] sm:$0xff] %v670_v27  ;;  %v655_v29 = vsel %vm654_vm14, 0.0, %v651_v28  ;;  %v638_v30 = vld [vmem:[%s631_s19] sm:$0xff] }
 0x218   : >> { %656 = vst [vmem:[%s644_s18] sm:$0xff] %v655_v29  ;;  %v642_v31 = vsel %vm641_vm15, 0.0, %v638_v30 }
 0x219   : >> { %643 = vst [vmem:[%s631_s19] sm:$0xff] %v642_v31 }
 0x21d   : >> { %v678_v32 = vld [vmem:[%s2634_s20] sm:$0xff] }
 0x21e   : >> { %v706_v33 = vld [vmem:[%s2636_s22] sm:$0xff]  ;;  %679 = vrot.lane.b32.xlu1 %v678_v32, %s2434_s24 }
 0x21f   : >> { %707 = vrot.lane.b32.xlu0 %v706_v33, %s2434_s24  ;;  %v710_v34 = vld [vmem:[%s2638_s23] sm:$0xff] }
 0x220   : >> { %711 = vrot.lane.b32.xlu2 %v710_v34, %s2434_s24  ;;  %v695_v35 = vld [vmem:[%s673_s25] sm:$0xff] }
 0x226   : >> { %675 = vrot.lane.b32.xlu1 %v695_v35, %s2434_s24 }
 0x228   : >> { %696 = vrot.lane.b32.xlu2 %v695_v35, %s2435_s1 }
 0x22e   : >> { %728 = vrot.lane.b32.xlu1 %v706_v33, %s2435_s1 }
 0x27a   : >> { %v712_v36 = vpop.permute.xlu2 %711 }
 0x27b   : >> { %v716_v44 = vsel %vm683_vm1, %v710_v34, %v712_v36 }
 0x282   : >> { %v697_v37 = vpop.permute.xlu2 %696 }
 0x283   : >> { %v701_v38 = vsel %vm700_vm0, %v678_v32, %v697_v37 }
 0x284   : >> { %703 = vst [vmem:[%s673_s25] sm:$0xff] %v701_v38 }
 0x28b   : >> { %v762_v39 = vld [vmem:[%s2646_s26] ss:$0 sm:$0xff]  ;;  %v1609_v41 = vld [vmem:[%s2646_s26 + $0x7] ss:$0 sm:$0xff] }
 0x28c   : >> { %v1608_v40 = vld [vmem:[%s2646_s26 - $0x1] sm:$0xfe] }
 0x28d   : >> { %v769_v42 = vsel %vm744_vm10, %v762_v39, %v1608_v40 }
 0x28e   : >> { %772 = vst [vmem:[%s2646_s26] sm:$0xff] %v769_v42 }
 0x290   : >> { %v680_v43 = vpop.permute.xlu1 %679 }
 0x291   : >> { %v708_v45 = vpop.permute.xlu0 %707  ;;  %v684_v48 = vsel %vm683_vm1, %v678_v32, %v680_v43 }
 0x292   : >> { %v720_v46 = vsel %vm687_vm3, %v708_v45, %v716_v44 }
 0x293   : >> { %v726_v47 = vsel %vm1391_vm2, %v720_v46, 0.0 }
 0x294   : >> { %734 = vst [vmem:[%s2638_s23] sm:$0xff] %v726_v47 }
 0x298   : >> { %v676_v49 = vpop.permute.xlu1 %675 }
 0x299   : >> { %v688_v50 = vsel %vm687_vm3, %v676_v49, %v684_v48 }
 0x29a   : >> { %v694_v51 = vsel %vm1391_vm2, %v688_v50, 0.0 }
 0x29b   : >> { %702 = vst [vmem:[%s2634_s20] sm:$0xff] %v694_v51  ;;  %v1607_v53 = vld [vmem:[%s737_s27 + $0x1] sm:$0x7f]  ;;  %v749_v60 = vld [vmem:[%s737_s27] ss:$0 sm:$0xff] }
 0x2a0   : >> { %v729_v52 = vpop.permute.xlu1 %728 }
 0x2a1   : >> { %v733_v54 = vsel %vm700_vm0, %v710_v34, %v729_v52 }
 0x2a2   : >> { %v738_v55 = vld [vmem:[%s736_s28] ss:$0 sm:$0xff]  ;;  %v1605_v57 = vld [vmem:[%s736_s28 + $0x7] ss:$0 sm:$0xff]  ;;  %735 = vst [vmem:[%s2636_s22] sm:$0xff] %v733_v54 }
 0x2a3   : >> { %v1604_v56 = vld [vmem:[%s736_s28 - $0x1] sm:$0xfe]  ;;  %v757_v59 = vsel %vm756_vm11, %v1605_v57, %v1607_v53 }
 0x2a4   : >> { %v745_v58 = vsel %vm744_vm10, %v738_v55, %v1604_v56  ;;  %759 = vst [vmem:[%s737_s27] sm:$0xff] %v757_v59 }
 0x2a5   : >> { %748 = vst [vmem:[%s736_s28] sm:$0xff] %v745_v58 }
 0x2a6   : >> { %1606 = vst [vmem:[%s736_s28 + $0x1] sm:$0x1] %v749_v60 }
 0x2a9   : >> { %v773_v61 = vld [vmem:[%s761_s29] ss:$0 sm:$0xff]  ;;  %v1611_v62 = vld [vmem:[%s761_s29 + $0x1] sm:$0x7f] }
 0x2aa   : >> { %1610 = vst [vmem:[%s2646_s26 + $0x1] sm:$0x1] %v773_v61  ;;  %v781_v63 = vsel %vm756_vm11, %v1609_v41, %v1611_v62  ;;  %379 = sbr.rel (!%p377_p5) target bundleno = 245 (0xf5), region = 435 }
 0x2ab   : >> { %783 = vst [vmem:[%s761_s29] sm:$0xff] %v781_v63  ;;  %v327_v4 = vld [vmem:[%s321_s11] sm:$0xff] (%p377_p5) }
 0x2ac   : > { %v328_v8 = vsel (%p377_p5), %vm1391_vm2, %v327_v4, 0.0 }
 0x2ad   : > { %v291_v0 = vld [vmem:[%s285_s2] sm:$0xff] (%p377_p5)  ;;  %v329_v12 = vmul.f32 (%p377_p5), %v328_v8, %v328_v8 }
 0x2ae   : > { %v292_v2 = vsel (%p377_p5), %vm1391_vm2, %v291_v0, 0.0 }
 0x2af   : > { %v293_v6 = vmul.f32 %v292_v2, %v292_v2 }
 0x2b1   : > { %v310_v1 = vld [vmem:[%s304_s10] sm:$0xff]  ;;  %v297_v15 = vsel %vm296_vm4, 0.0, %v293_v6 }
 0x2b2   : > { %v311_v3 = vsel %vm1391_vm2, %v310_v1, 0.0  ;;  %v344_v5 = vld [vmem:[%s338_s12] sm:$0xff] }
 0x2b3   : > { %v312_v7 = vmul.f32 %v311_v3, %v311_v3  ;;  %v345_v11 = vsel %vm1391_vm2, %v344_v5, 0.0 }
 0x2b4   : > { %v346_v14 = vmul.f32 %v345_v11, %v345_v11 }
 0x2b5   : > { %v314_v13 = vadd.f32 %v312_v7, %v293_v6  ;;  %v313_v17 = vadd.f32 %v312_v7, %v297_v15 }
 0x2b6   : > { %v350_v20 = vsel %vm349_vm5, 0.0, %v346_v14 }
 0x2b7   : > { %v331_v16 = vadd.f32 %v329_v12, %v314_v13  ;;  %v330_v19 = vadd.f32 %v329_v12, %v313_v17 }
 0x2b9   : > { %v352_v18 = vadd.f32 %v346_v14, %v331_v16  ;;  %v351_v21 = vadd.f32 %v350_v20, %v330_v19 }
 0x2bb   : > { %353 = vadd.xlane.f32.xlu0 %v352_v18 }
 0x2c3   : > { %361 = vadd.xlane.f32.xlu0 %v351_v21 }
 0x32e   : > { %v354_v22 = vpop.xlane.xlu0 %353 }
 0x32f   : > { %v355_v23 = vrot.slane %v354_v22, 4 }
 0x331   : > { %v356_v24 = vadd.f32 %v355_v23, %v354_v22 }
 0x333   : > { %v357_v25 = vrot.slane %v356_v24, 2 }
 0x335   : > { %v358_v29 = vadd.f32 %v357_v25, %v356_v24 }
 0x336   : > { %v362_v26 = vpop.xlane.xlu0 %361 }
 0x337   : > { %v363_v27 = vrot.slane %v362_v26, 4  ;;  %v359_v32 = vrot.slane %v358_v29, 1 }
 0x339   : > { %v364_v28 = vadd.f32 %v363_v27, %v362_v26  ;;  %v360_v35 = vadd.f32 %v359_v32, %v358_v29 }
 0x33b   : > { %v365_v30 = vrot.slane %v364_v28, 2 }
 0x33d   : > { %v366_v31 = vadd.f32 %v365_v30, %v364_v28 }
 0x33f   : > { %v367_v33 = vrot.slane %v366_v31, 1 }
 0x341   : > { %v368_v34 = vadd.f32 %v367_v33, %v366_v31 }
 0x343   : > { %1646 = vpush %v368_v34 }
 0x344   : > { %1648 = vpush %v360_v35 }
 0x374   : > { %s1647_s21 = spop %1646 }
 0x375   : > { %s1649_s3 = spop %1648 }
 0x376   : > { %s371_s13 = smul.f32 1e-10, %s1649_s3 }
 0x378   : > { %p372_p7 = scmp.le.f32.partialorder %s1647_s21, %s371_s13 }
 0x37a   : > { %p374_p8 = por %p373_p6, %p372_p7 }
 0x37c   :  { %862 = sbr.rel (!%p374_p8) target bundleno = 244 (0xf4), region = 446 }
 0x381 PF:  { %s863_s14 = smov [#allocation12]  ;;  %v867_v9 = vmov %v2510_v9  ;;  %v870_v10 = vmov %v2512_v10  ;;  %s883_s15 = smov [#allocation15] }
 0x382   :  { %v887_v9 = vmov %v2510_v9  ;;  %v890_v10 = vmov %v2512_v10  ;;  %v871_v36 = vld [vmem:[%s863_s14] sm:$0xff]  ;;  %vm874_vm6 = vcmp.eq.s32.totalorder %v870_v10, %v867_v9  ;;  %s864_s0 = smov [#allocation4]  ;;  %s884_s16 = smov [#allocation6] }
 0x383   :  { %vm894_vm7 = vcmp.eq.s32.totalorder %v890_v10, %v887_v9  ;;  %v875_v37 = vsel %vm874_vm6, %v871_v36, 0.0  ;;  %v891_v38 = vld [vmem:[%s883_s15] sm:$0xff]  ;;  %s2401_s24 = smov %s2727_s6   ;;  %s2405_s25 = smov [#allocation8]  }
 0x384   :  { %v876_v39 = vrot.slane %v875_v37, 4  ;;  %v895_v40 = vsel %vm894_vm7, %v891_v38, 0.0 }
 0x385   :  { %v896_v41 = vrot.slane %v895_v40, 4 }
 0x386   :  { %v877_v42 = vadd.f32 %v876_v39, %v875_v37 }
 0x387   :  { %v897_v43 = vadd.f32 %v896_v41, %v895_v40 }
 0x388   :  { %v878_v44 = vrot.slane %v877_v42, 2 }
 0x389   :  { %v898_v45 = vrot.slane %v897_v43, 2 }
 0x38a   :  { %v879_v46 = vadd.f32 %v878_v44, %v877_v42 }
 0x38b   :  { %v899_v47 = vadd.f32 %v898_v45, %v897_v43 }
 0x38c   :  { %v880_v48 = vrot.slane %v879_v46, 1 }
 0x38d   :  { %v900_v49 = vrot.slane %v899_v47, 1 }
 0x38e   :  { %v881_v50 = vadd.f32 %v880_v48, %v879_v46 }
 0x38f   :  { %v901_v51 = vadd.f32 %v900_v49, %v899_v47 }
 0x390   :  { %882 = vst [vmem:[%s864_s0] sm:$0x1] %v881_v50 }
 0x391   :  { %902 = vst [vmem:[%s884_s16] sm:$0x1] %v901_v51 }
 0x397   :  { %v905_v9 = vld [vmem:[#allocation4] sm:$0x1] }
 0x398   :  { %908 = vst [vmem:[#allocation5] sm:$0x1] %v905_v9  ;;  %v911_v10 = vld [vmem:[#allocation6] sm:$0x1] }
 0x399   :  { %914 = vst [vmem:[#allocation7] sm:$0x1] %v911_v10 }
 0x39f   :  { %v971_v52 = vld [vmem:[#allocation5] sm:$0x1] }
 0x3a0   :  { %972 = vst [vmem:[%s2725_s4] sm:$0x1] %v971_v52  ;;  %v1029_v53 = vld [vmem:[#allocation7] sm:$0x1] }
 0x3a1   :  { %1030 = vst [vmem:[%s2726_s5] sm:$0x1] %v1029_v53 }
 0x3a2 LB: > { %v1074_v54 = vld [vmem:[%s2407_s25] sm:$0xff]  ;;  %s1076_s25 = scalar_lea.vmem %s2407_s25, 8   ;;  %s2407_s25 = sphi %s2405_s25, %s1076_s25   ;;  %s2403_s24 = sphi %s2401_s24, %s1077_s24  }
 0x3a3   : > { %1075 = vst [vmem:[%s2403_s24] sm:$0xff] %v1074_v54  ;;  %s1077_s24 = scalar_lea.vmem %s2403_s24, 8   ;;  %p1071_p9 = scmp.gt.s32.totalorder %s1076_s25, [#allocation8] }
 0x3a4   :  { %s2409_s5 = smov (%p1071_p9), %s2728_s7   ;;  %s2413_s26 = smov (%p1071_p9), [#allocation9]  }
 0x3a5   :  { %1073 = sbr.rel (!%p1071_p9) target bundleno = 930 (0x3a2), region = 512 }
 0x3aa LB: > { %v1130_v55 = vld [vmem:[%s2415_s26] sm:$0xff]  ;;  %s1132_s26 = scalar_lea.vmem %s2415_s26, 8   ;;  %s2415_s26 = sphi %s2413_s26, %s1132_s26   ;;  %s2411_s5 = sphi %s2409_s5, %s1133_s5  }
 0x3ab   : > { %1131 = vst [vmem:[%s2411_s5] sm:$0xff] %v1130_v55  ;;  %s1133_s5 = scalar_lea.vmem %s2411_s5, 8   ;;  %p1127_p10 = scmp.gt.s32.totalorder %s1132_s26, [#allocation9] }
 0x3ac   :  { %s2417_s28 = smov (%p1127_p10), %s2729_s8   ;;  %s2421_s29 = smov (%p1127_p10), [#allocation10]  }
 0x3ad   :  { %1129 = sbr.rel (!%p1127_p10) target bundleno = 938 (0x3aa), region = 534 }
 0x3b2 LB: > { %v1186_v56 = vld [vmem:[%s2423_s29] sm:$0xff]  ;;  %s1188_s29 = scalar_lea.vmem %s2423_s29, 8   ;;  %s2423_s29 = sphi %s2421_s29, %s1188_s29   ;;  %s2419_s28 = sphi %s2417_s28, %s1189_s28  }
 0x3b3   : > { %1187 = vst [vmem:[%s2419_s28] sm:$0xff] %v1186_v56  ;;  %s1189_s28 = scalar_lea.vmem %s2419_s28, 8   ;;  %p1183_p11 = scmp.gt.s32.totalorder %s1188_s29, [#allocation10] }
 0x3b4   :  { %s2425_s2 = smov (%p1183_p11), %s2730_s9   ;;  %s2429_s10 = smov (%p1183_p11), [#allocation11]  }
 0x3b5   :  { %1185 = sbr.rel (!%p1183_p11) target bundleno = 946 (0x3b2), region = 556 }
 0x3ba LB: > { %v1242_v57 = vld [vmem:[%s2431_s10] sm:$0xff]  ;;  %s1244_s10 = scalar_lea.vmem %s2431_s10, 8   ;;  %s2431_s10 = sphi %s2429_s10, %s1244_s10   ;;  %s2427_s2 = sphi %s2425_s2, %s1245_s2  }
 0x3bb   : > { %1243 = vst [vmem:[%s2427_s2] sm:$0xff] %v1242_v57  ;;  %s1245_s2 = scalar_lea.vmem %s2427_s2, 8   ;;  %p1239_p12 = scmp.gt.s32.totalorder %s1244_s10, [#allocation11] }
 0x3bd   :  { %1241 = sbr.rel (!%p1239_p12) target bundleno = 954 (0x3ba), region = 578 }

// kernel: custom-call.9
= control target key start
LH: loop header
LB: loop body
LE: loop exit
PB: predicated region body
PF: predicated region fallthrough
CT: control target
= control target key end

     0   :  { %s1712_s30 = smov 0   ;;  %s1714_s10 = smov 0   ;;  %s2042_s0 = inlined_call_operand.vmem [shape: f32[8,8,8], index: 0, kind: input, shape index: {}]   ;;  %s2043_s1 = inlined_call_operand.vmem [shape: f32[8,8,8], index: 1, kind: input, shape index: {}]   ;;  %s2044_s2 = inlined_call_operand.vmem [shape: f32[8,8,8], index: 2, kind: input, shape index: {}]   ;;  %s2045_s3 = inlined_call_operand.vmem [shape: f32[8,8,8], index: 3, kind: input, shape index: {}]   ;;  %s2046_s4 = inlined_call_operand.vmem [shape: f32[8,8], index: 4, kind: output, shape index: {0}]   ;;  %s2047_s5 = inlined_call_operand.vmem [shape: f32[8,8], index: 5, kind: output, shape index: {1}]   ;;  %s2048_s6 = inlined_call_operand.vmem [shape: f32[8,8,8], index: 6, kind: output, shape index: {2}]   ;;  %s2049_s7 = inlined_call_operand.vmem [shape: f32[8,8,8], index: 7, kind: output, shape index: {3}]   ;;  %s2050_s8 = inlined_call_operand.vmem [shape: f32[8,8,8], index: 8, kind: output, shape index: {4}]   ;;  %s2051_s9 = inlined_call_operand.vmem [shape: f32[8,8,8], index: 9, kind: output, shape index: {5}]  }
   0x1   :  { %s1716_s11 = smov 0  }
   0x2 LB: > { %s1728_s12 = sadd.s32 4294967295, %s1649_s11   ;;  %s1731_s13 = sadd.s32 1, %s1649_s11   ;;  %s1649_s11 = sphi %s1716_s11, %s2058_s11   ;;  %s1645_s10 = sphi %s1714_s10, %s2057_s10   ;;  %s1641_s30 = sphi %s1712_s30, %s2056_s30  }
   0x3   : > { %s20_s14 = sshrl.u32 %s1649_s11, 3  ;;  %s21_s15 = sshrl.u32 %s1731_s13, 3 }
   0x4   : > { %s22_s16 = ssub.s32 %s20_s14, %s21_s15  ;;  %s25_s17 = sadd.s32 1, %s1645_s10 }
   0x5   : > { %p23_p0 = scmp.eq.s32.totalorder %s22_s16, 0  ;;  %p35_p1 = scmp.ne.s32.totalorder %s1645_s10, %s1641_s30 }
   0x6   : > { %p36_p2 = scmp.eq.s32.totalorder %s1728_s12, 7  ;;  %p1510_p4 = scmp.ge.s32.totalorder %s1649_s11, 8 }
   0x7   : > { %s1740_s18 = scalar_select %p23_p0, %s1645_s10, %s25_s17  }
   0x8   : > { %p1742_p3 = por %p36_p2, %p35_p1  ;;  %86 = sbr.rel (%p1510_p4) target bundleno = 18 (0x12), region = 16 }
   0x9   : > { %2052 = sst [smem:[#allocation23_spill]] %s1740_s18  ;;  %s88_s20 = sand.u32 (!%p1510_p4), 1, %s1649_s11  }
   0xa   : > { %s1512_s21 = sshll.u32 (!%p1510_p4), %s1649_s11, 3  ;;  %s1511_s22 = sshll.u32 (!%p1510_p4), %s88_s20, 3 }
   0xb   : > { %s92_s25 = scalar_lea.vmem (!%p1510_p4), %s2042_s0, %s1512_s21  ;;  %s90_s26 = scalar_lea.vmem (!%p1510_p4), [#allocation0], %s1511_s22 }
   0xc   : > { %s131_s29 = scalar_lea.vmem (!%p1510_p4), %s2043_s1, %s1512_s21  ;;  %s170_s16 = scalar_lea.vmem (!%p1510_p4), %s2044_s2, %s1512_s21 }
   0xd   : > { %v121_v0 = vld [vmem:[%s92_s25] sm:$0xff]  ;;  %s129_s17 = scalar_lea.vmem [#allocation1], %s1511_s22  ;;  %s209_s23 = scalar_lea.vmem %s2045_s3, %s1512_s21 }
   0xe   : > { %122 = vst [vmem:[%s90_s26] sm:$0xff] %v121_v0  ;;  %v160_v1 = vld [vmem:[%s131_s29] sm:$0xff]  ;;  %s168_s24 = scalar_lea.vmem [#allocation2], %s1511_s22  ;;  %s207_s25 = scalar_lea.vmem [#allocation3], %s1511_s22 }
   0xf   : > { %161 = vst [vmem:[%s129_s17] sm:$0xff] %v160_v1  ;;  %v199_v2 = vld [vmem:[%s170_s16] sm:$0xff] }
  0x10   : > { %200 = vst [vmem:[%s168_s24] sm:$0xff] %v199_v2  ;;  %v238_v3 = vld [vmem:[%s209_s23] sm:$0xff] }
  0x11   : > { %239 = vst [vmem:[%s207_s25] sm:$0xff] %v238_v3 }
  0x12 PF: > { %p1519_p5 = scmp.ge.s32.totalorder %s1649_s11, 1  ;;  %p244_p6 = scmp.lt.s32.totalorder %s1649_s11, 9 }
  0x14   : > { %p245_p7 = pnand %p1519_p5, %p244_p6 }
  0x16   : > { %248 = sbr.rel (%p245_p7) target bundleno = 938 (0x3aa), region = 156 }
  0x1b   : > { %s251_s26 = sand.u32 1, %s1728_s12   ;;  %s285_s27 = sand.u32 1, %s1641_s30   ;;  %v329_v4 = vlaneseq  ;;  %v1659_v9 = vmov 0.0  }
  0x1c   : > { %s1765_s28 = sshll.u32 %s251_s26, 3  ;;  %s1767_s18 = sshll.u32 %s285_s27, 3 }
  0x1d   : > { %v1769_v5 = vand.u32 127, %v329_v4  ;;  %v1771_v6 = vshrl.u32 %v329_v4, 7  ;;  %s253_s11 = scalar_lea.vmem [#allocation0], %s1765_s28  ;;  %s257_s21 = scalar_lea.vmem [#allocation1], %s1765_s28 }
  0x1e   : > { %v313_v7 = vld [vmem:[%s253_s11] sm:$0xff]  ;;  %v316_v8 = vld [vmem:[%s257_s21] sm:$0xff]  ;;  %s1776_s30 = scalar_lea.vmem [#allocation6], %s1765_s28  ;;  %s312_s22 = smov [#allocation10] }
  0x1f   : > { %324 = vst [vmem:[%s1776_s30] sm:$0xff] %v1659_v9  ;;  %s315_s29 = smov [#allocation11]  ;;  %s261_s14 = scalar_lea.vmem [#allocation2], %s1765_s28  ;;  %v331_v5 = vmov %v1769_v5  ;;  %v334_v6 = vmov %v1771_v6  ;;  %vm1399_vm2 = vcmp.lt.s32.totalorder %v1769_v5, 8 }
  0x20   : > { %v319_v10 = vld [vmem:[%s261_s14] sm:$0xff]  ;;  %s1781_s15 = scalar_lea.vmem [#allocation7], %s1765_s28  ;;  %314 = vst [vmem:[%s312_s22] sm:$0xff] %v313_v7  ;;  %s318_s16 = smov [#allocation12]  ;;  %vm338_vm0 = vcmp.eq.s32.totalorder %v334_v6, %v331_v5  ;;  %v344_v5 = vmov %v1769_v5  ;;  %v347_v6 = vmov %v1771_v6 }
  0x21   : > { %325 = vst [vmem:[%s1781_s15] sm:$0xff] %v1659_v9  ;;  %s321_s17 = smov [#allocation13]  ;;  %s265_s20 = scalar_lea.vmem [#allocation3], %s1765_s28  ;;  %vm351_vm1 = vcmp.eq.s32.totalorder %v347_v6, %v344_v5  ;;  %v1391_v5 = vmov %v1769_v5  ;;  %v1394_v6 = vmov %v1771_v6 }
  0x22   : > { %v322_v11 = vld [vmem:[%s265_s20] sm:$0xff]  ;;  %317 = vst [vmem:[%s315_s29] sm:$0xff] %v316_v8  ;;  %s328_s30 = smov %s1776_s30  ;;  %s1789_s23 = scalar_lea.vmem [#allocation8], %s1765_s28  ;;  %v1408_v5 = vmov %v1769_v5  ;;  %v1411_v6 = vmov %v1771_v6  ;;  %vm1404_vm3 = vcmp.eq.s32.totalorder %v1394_v6, %v1391_v5 }
  0x23   : > { %320 = vst [vmem:[%s318_s16] sm:$0xff] %v319_v10  ;;  %s1793_s24 = scalar_lea.vmem [#allocation9], %s1765_s28  ;;  %s287_s25 = scalar_lea.vmem [#allocation4], %s1767_s18  ;;  %v1425_v5 = vmov %v1769_v5  ;;  %v1428_v6 = vmov %v1771_v6 }
  0x24   : > { %323 = vst [vmem:[%s321_s17] sm:$0xff] %v322_v11  ;;  %s293_s26 = scalar_lea.vmem [#allocation5], %s1767_s18  ;;  %s1395_s27 = smov [#allocation10]  ;;  %v1442_v5 = vmov %v1769_v5  ;;  %v1445_v6 = vmov %v1771_v6 }
  0x25   : > { %326 = vst [vmem:[%s1789_s23] sm:$0xff] %v1659_v9  ;;  %s1412_s28 = smov [#allocation11]  ;;  %s1429_s11 = smov [#allocation12]  ;;  %vm1455_vm4 = vcmp.eq.s32.totalorder %v1445_v6, %v1442_v5 }
  0x26   : > { %327 = vst [vmem:[%s1793_s24] sm:$0xff] %v1659_v9  ;;  %v335_v12 = vld [vmem:[%s328_s30] sm:$0xff]  ;;  %s341_s24 = smov %s1793_s24  ;;  %s1446_s21 = smov [#allocation13] }
  0x27   : > { %v339_v13 = vsel %vm338_vm0, 1.0, %v335_v12  ;;  %v1401_v16 = vld [vmem:[%s1395_s27] sm:$0xff] }
  0x28   : > { %340 = vst [vmem:[%s328_s30] sm:$0xff] %v339_v13  ;;  %v1402_v18 = vsel %vm1399_vm2, %v1401_v16, 0.0 }
  0x29   : > { %v1418_v17 = vld [vmem:[%s1412_s28] sm:$0xff]  ;;  %v1403_v22 = vmul.f32 %v1402_v18, %v1402_v18 }
  0x2a   : > { %v1419_v19 = vsel %vm1399_vm2, %v1418_v17, 0.0  ;;  %v1435_v20 = vld [vmem:[%s1429_s11] sm:$0xff] }
  0x2b   : > { %v1452_v21 = vld [vmem:[%s1446_s21] sm:$0xff]  ;;  %v1420_v23 = vmul.f32 %v1419_v19, %v1419_v19  ;;  %v1436_v24 = vsel %vm1399_vm2, %v1435_v20, 0.0  ;;  %v1405_v29 = vsel %vm1404_vm3, 0.0, %v1403_v22 }
  0x2c   : > { %v1453_v25 = vsel %vm1399_vm2, %v1452_v21, 0.0  ;;  %v1437_v26 = vmul.f32 %v1436_v24, %v1436_v24 }
  0x2d   : > { %v348_v14 = vld [vmem:[%s341_s24] sm:$0xff]  ;;  %v1422_v27 = vadd.f32 %v1420_v23, %v1403_v22  ;;  %v1454_v28 = vmul.f32 %v1453_v25, %v1453_v25  ;;  %v1421_v31 = vadd.f32 %v1420_v23, %v1405_v29 }
  0x2e   : > { %v352_v15 = vsel %vm351_vm1, 1.0, %v348_v14 }
  0x2f   : > { %353 = vst [vmem:[%s341_s24] sm:$0xff] %v352_v15  ;;  %v1439_v30 = vadd.f32 %v1437_v26, %v1422_v27  ;;  %v1438_v33 = vadd.f32 %v1437_v26, %v1421_v31  ;;  %v1456_v34 = vsel %vm1455_vm4, 0.0, %v1454_v28 }
  0x31   : > { %v1458_v32 = vadd.f32 %v1454_v28, %v1439_v30  ;;  %v1457_v35 = vadd.f32 %v1456_v34, %v1438_v33 }
  0x33   : > { %1459 = vadd.xlane.f32.xlu0 %v1458_v32 }
  0x3b   : > { %1467 = vadd.xlane.f32.xlu0 %v1457_v35 }
  0xa6   : > { %v1460_v36 = vpop.xlane.xlu0 %1459 }
  0xa7   : > { %v1461_v37 = vrot.slane %v1460_v36, 4 }
  0xa9   : > { %v1462_v38 = vadd.f32 %v1461_v37, %v1460_v36 }
  0xab   : > { %v1463_v39 = vrot.slane %v1462_v38, 2 }
  0xad   : > { %v1464_v43 = vadd.f32 %v1463_v39, %v1462_v38 }
  0xae   : > { %v1468_v40 = vpop.xlane.xlu0 %1467 }
  0xaf   : > { %v1469_v41 = vrot.slane %v1468_v40, 4  ;;  %v1465_v46 = vrot.slane %v1464_v43, 1 }
  0xb1   : > { %v1470_v42 = vadd.f32 %v1469_v41, %v1468_v40  ;;  %v1466_v49 = vadd.f32 %v1465_v46, %v1464_v43 }
  0xb3   : > { %v1471_v44 = vrot.slane %v1470_v42, 2 }
  0xb5   : > { %v1472_v45 = vadd.f32 %v1471_v44, %v1470_v42 }
  0xb7   : > { %v1473_v47 = vrot.slane %v1472_v45, 1 }
  0xb9   : > { %v1474_v48 = vadd.f32 %v1473_v47, %v1472_v45 }
  0xbb   : > { %1560 = vpush %v1474_v48 }
  0xbc   : > { %1562 = vpush %v1466_v49 }
  0xec   : > { %s1561_s22 = spop %1560 }
  0xed   : > { %s1563_s29 = spop %1562 }
  0xee   : > { %s1477_s14 = smul.f32 1e-10, %s1563_s29 }
  0xf0   : > { %p1478_p8 = scmp.le.f32.partialorder %s1561_s22, %s1477_s14 }
  0xf1   : > { %s1818_s16 = smov (!%p1478_p8), 0  }
  0xf2   : > { %1481 = sbr.rel (%p1478_p8) target bundleno = 900 (0x384), region = 507 }
  0xf7 LB: >> { %s1823_s17 = smov 0   ;;  %s1653_s16 = sphi %s1818_s16, %s2054_s16  }
  0xf8 LB: >>> { %s458_s20 = smov [#allocation10]  ;;  %v462_v5 = vmov %v1769_v5  ;;  %v465_v6 = vmov %v1771_v6  ;;  %s478_s27 = smov [#allocation11]  ;;  %s1657_s17 = sphi %s1823_s17, %s457_s17  }
  0xf9   : >>> { %v482_v5 = vmov %v1769_v5  ;;  %v485_v6 = vmov %v1771_v6  ;;  %v466_v50 = vld [vmem:[%s458_s20] sm:$0xff]  ;;  %vm469_vm5 = vcmp.eq.s32.totalorder %v465_v6, %v462_v5  ;;  %s498_s28 = smov [#allocation13]  ;;  %s459_s11 = smov [#allocation14] }
  0xfa   : >>> { %vm489_vm6 = vcmp.eq.s32.totalorder %v485_v6, %v482_v5  ;;  %v502_v5 = vmov %v1769_v5  ;;  %v505_v6 = vmov %v1771_v6  ;;  %v470_v51 = vsel %vm469_vm5, %v466_v50, 0.0  ;;  %v486_v52 = vld [vmem:[%s478_s27] sm:$0xff]  ;;  %s479_s21 = smov [#allocation15]  ;;  %s499_s22 = smov [#allocation16] }
  0xfb   : >>> { %vm509_vm7 = vcmp.eq.s32.totalorder %v505_v6, %v502_v5  ;;  %v471_v53 = vrot.slane %v470_v51, 4  ;;  %v490_v54 = vsel %vm489_vm6, %v486_v52, 0.0  ;;  %v506_v55 = vld [vmem:[%s498_s28] sm:$0xff]  ;;  %s522_s29 = smov [#allocation15]  ;;  %s520_s14 = smov [#allocation14]  ;;  %v611_v5 = vmov %v1769_v5 }
  0xfc   : >>> { %v491_v56 = vrot.slane %v490_v54, 4  ;;  %v510_v57 = vsel %vm509_vm7, %v506_v55, 0.0  ;;  %s524_s20 = smov [#allocation16]  ;;  %s599_s27 = smov [#allocation17]  ;;  %v614_v6 = vmov %v1771_v6 }
  0xfd   : >>> { %v472_v58 = vadd.f32 %v471_v53, %v470_v51  ;;  %v511_v59 = vrot.slane %v510_v57, 4  ;;  %s601_s28 = smov [#allocation18]  ;;  %s1850_s30 = smov %s1776_s30 }
  0xfe   : >>> { %v492_v60 = vadd.f32 %v491_v56, %v490_v54  ;;  %s1853_s15 = smov %s1781_s15  ;;  %s1858_s23 = smov %s1789_s23 }
  0xff   : >>> { %v473_v61 = vrot.slane %v472_v58, 2  ;;  %v512_v62 = vadd.f32 %v511_v59, %v510_v57  ;;  %s1863_s24 = smov %s1793_s24  ;;  %s457_s17 = sadd.s32 1, %s1657_s17  }
 0x100   : >>> { %v493_v63 = vrot.slane %v492_v60, 2  ;;  %p454_p9 = scmp.ge.s32.totalorder %s457_s17, 15  }
 0x101   : >>> { %v474_v0 = vadd.f32 %v473_v61, %v472_v58  ;;  %v513_v1 = vrot.slane %v512_v62, 2 }
 0x102   : >>> { %v494_v2 = vadd.f32 %v493_v63, %v492_v60 }
 0x103   : >>> { %v475_v3 = vrot.slane %v474_v0, 1  ;;  %v514_v4 = vadd.f32 %v513_v1, %v512_v62 }
 0x104   : >>> { %v495_v7 = vrot.slane %v494_v2, 1 }
 0x105   : >>> { %v476_v8 = vadd.f32 %v475_v3, %v474_v0  ;;  %v515_v9 = vrot.slane %v514_v4, 1 }
 0x106   : >>> { %v496_v10 = vadd.f32 %v495_v7, %v494_v2 }
 0x107   : >>> { %477 = vst [vmem:[%s459_s11] sm:$0x1] %v476_v8  ;;  %v516_v11 = vadd.f32 %v515_v9, %v514_v4  ;;  %s518_s11 = smov [#allocation19] }
 0x108   : >>> { %497 = vst [vmem:[%s479_s21] sm:$0x1] %v496_v10  ;;  %s519_s21 = smov [#allocation20]  ;;  %s603_s11 = smov %s518_s11 }
 0x109   : >>> { %517 = vst [vmem:[%s499_s22] sm:$0x1] %v516_v11  ;;  %s605_s21 = smov %s519_s21  ;;  %s607_s22 = smov [#allocation19] }
 0x10e   : >>> { %v521_v19 = vld [vmem:[%s520_s14] sm:$0xff]  ;;  %s620_s14 = smov [#allocation21] }
 0x10f   : >>> { %v1834_v12 = vld [vmem:[%s522_s29] sm:$0xff]  ;;  %v575_v43 = vand.u32 2147483647, %v521_v19  ;;  %s622_s29 = smov [#allocation20] }
 0x110   : >>> { %v527_v13 = vmul.f32 2.0, %v1834_v12  ;;  %v525_v20 = vld [vmem:[%s524_s20] sm:$0xff]  ;;  %v576_v51 = vand.u32 2147483647, %v1834_v12  ;;  %s635_s20 = smov [#allocation22] }
 0x111   : >>> { %v526_v23 = vsub.f32 %v525_v20, %v521_v19  ;;  %v577_v44 = vand.u32 2147483647, %v525_v20 }
 0x112   : >>> { %1611 = vrcp.f32 %v527_v13  ;;  %v539_v16 = vand.u32 2147483648, %v527_v13  ;;  %vm533_vm8 = vweird.f32 %v527_v13  ;;  %v537_v18 = vand.u32 2147483647, %v527_v13 }
 0x113   : >>> { %v578_v46 = vmin.f32 %v575_v43, %v577_v44 }
 0x114   : >>> { %v540_v22 = vor.u32 1.1754944e-38, %v539_v16  ;;  %vm538_vm11 = vcmp.eq.f32.partialorder %v537_v18, 8.507059e+37 }
 0x115   : >>> { %v579_v52 = vmul.f32 1.1920929e-08, %v578_v46 }
 0x117   : >>> { %vm580_vm4 = vcmp.le.f32.partialorder %v576_v51, %v579_v52 }
 0x118   : >>> { %v1612_v14 = vpop.eup %1611 }
 0x119   : >>> { %v529_v15 = vmul.f32 %v1612_v14, %v527_v13  ;;  %vm534_vm9 = vweird.f32 %v1612_v14 }
 0x11a   : >>> { %vm535_vm10 = vmor %vm533_vm8, %vm534_vm9  ;;  %vm616_vm8 = vcmp.eq.s32.totalorder %v614_v6, %v611_v5  ;;  %v626_v5 = vmov %v1769_v5  ;;  %v629_v6 = vmov %v1771_v6 }
 0x11b   : >>> { %v530_v17 = vsub.f32 1.0, %v529_v15  ;;  %vm631_vm9 = vcmp.eq.s32.totalorder %v629_v6, %v626_v5  ;;  %v697_v5 = vmov %v1769_v5 }
 0x11c   : >>> { %v738_v5 = vmov %v1769_v5 }
 0x11d   : >>> { %v531_v21 = vmul.f32 %v1612_v14, %v530_v17  ;;  %v724_v5 = vmov %v1769_v5 }
 0x11f   : >>> { %v532_v24 = vadd.f32 %v1612_v14, %v531_v21 }
 0x121   : >>> { %v536_v25 = vsel %vm535_vm10, %v1612_v14, %v532_v24  ;;  %v871_v24 = vld [vmem:[%s1858_s23] sm:$0xff]  ;;  %vm821_vm10 = vcmp.eq.s32.totalorder %v1771_v6, 0 }
 0x122   : >>> { %v541_v26 = vsel %vm538_vm11, %v540_v22, %v536_v25  ;;  %vm833_vm11 = vcmp.eq.s32.totalorder %v1771_v6, 7  ;;  %v700_v6 = vmov %v1771_v6 }
 0x123   : >>> { %v542_v27 = vmul.f32 %v541_v26, %v526_v23  ;;  %v741_v6 = vmov %v1771_v6 }
 0x124   : >>> { %v727_v6 = vmov %v1771_v6 }
 0x125   : >>> { %v544_v28 = vmul.f32 %v542_v27, %v542_v27  ;;  %vm543_vm14 = vcmp.ge.f32.partialorder %v542_v27, 0.0 }
 0x127   : >>> { %v545_v29 = vadd.f32 1.0, %v544_v28 }
 0x129   : >>> { %1613 = vrsqrt.f32 %v545_v29  ;;  %vm553_vm12 = vcmp.eq.f32.partialorder %v545_v29, inf  ;;  %v556_v36 = vand.u32 2147483648, %v545_v29  ;;  %vm555_vm13 = vcmp.eq.f32.partialorder %v545_v29, 0.0 }
 0x12f   : >>> { %v1614_v30 = vpop.eup %1613 }
 0x130   : >>> { %v547_v31 = vmul.f32 %v1614_v30, %v545_v29 }
 0x132   : >>> { %v548_v32 = vmul.f32 %v1614_v30, %v547_v31 }
 0x134   : >>> { %v549_v33 = vmul.f32 0.5, %v548_v32 }
 0x136   : >>> { %v550_v34 = vsub.f32 1.5, %v549_v33 }
 0x138   : >>> { %v551_v35 = vmul.f32 %v1614_v30, %v550_v34 }
 0x13a   : >>> { %v552_v37 = vmul.f32 %v551_v35, %v545_v29 }
 0x13c   : >>> { %v554_v38 = vsel %vm553_vm12, %v545_v29, %v552_v37  ;;  %v872_v29 = vld [vmem:[%s1863_s24] sm:$0xff]  ;;  %vm705_vm12 = vcmp.eq.s32.totalorder %v700_v6, %v697_v5  ;;  %v711_v5 = vmov %v1769_v5  ;;  %v714_v6 = vmov %v1771_v6 }
 0x13d   : >>> { %v557_v39 = vsel %vm555_vm13, %v556_v36, %v554_v38  ;;  %vm746_vm13 = vcmp.eq.s32.totalorder %v741_v6, %v738_v5 }
 0x13e   : >>> { %v558_v40 = vxor.u32 2147483648, %v557_v39 }
 0x140   : >>> { %v559_v41 = vsel %vm543_vm14, %v557_v39, %v558_v40  ;;  %vm731_vm14 = vcmp.eq.s32.totalorder %v727_v6, %v724_v5 }
 0x141   : >>> { %v560_v42 = vadd.f32 %v559_v41, %v542_v27 }
 0x143   : >>> { %1615 = vrcp.f32 %v560_v42  ;;  %v572_v48 = vand.u32 2147483648, %v560_v42  ;;  %vm566_vm15 = vweird.f32 %v560_v42  ;;  %v570_v50 = vand.u32 2147483647, %v560_v42 }
 0x145   : >>> { %v573_v54 = vor.u32 1.1754944e-38, %v572_v48  ;;  %vm571_vm3 = vcmp.eq.f32.partialorder %v570_v50, 8.507059e+37 }
 0x149   : >>> { %v1616_v45 = vpop.eup %1615 }
 0x14a   : >>> { %v562_v47 = vmul.f32 %v1616_v45, %v560_v42  ;;  %vm567_vm0 = vweird.f32 %v1616_v45 }
 0x14b   : >>> { %vm568_vm1 = vmor %vm566_vm15, %vm567_vm0  ;;  %vm718_vm15 = vcmp.eq.s32.totalorder %v714_v6, %v711_v5  ;;  %vm777_vm0 = vcmp.eq.s32.totalorder %v1769_v5, 7  ;;  %v361_v6 = vmov (%p454_p9), %v1771_v6 }
 0x14c   : >>> { %v563_v49 = vsub.f32 1.0, %v562_v47 }
 0x14e   : >>> { %v564_v53 = vmul.f32 %v1616_v45, %v563_v49 }
 0x150   : >>> { %v565_v55 = vadd.f32 %v1616_v45, %v564_v53 }
 0x152   : >>> { %v569_v56 = vsel %vm568_vm1, %v1616_v45, %v565_v55  ;;  %vm760_vm1 = vcmp.eq.s32.totalorder %v1769_v5, 0 }
 0x153   : >>> { %v574_v57 = vsel %vm571_vm3, %v573_v54, %v569_v56  ;;  %vm764_vm3 = vcmp.eq.s32.totalorder %v1769_v5, 1  ;;  %v358_v5 = vmov (%p454_p9), %v1769_v5 }
 0x154   : >>> { %v581_v58 = vsel %vm580_vm4, 0.0, %v574_v57  ;;  %vm373_vm4 = vcmp.eq.s32.totalorder (%p454_p9), %v361_v6, %v358_v5  ;;  %v377_v5 = vmov (%p454_p9), %v1769_v5  ;;  %v380_v6 = vmov (%p454_p9), %v1771_v6 }
 0x155   : >>> { %v582_v59 = vmul.f32 %v581_v58, %v581_v58  ;;  %v595_v60 = vmul.f32 %v581_v58, %v1834_v12  ;;  %v394_v5 = vmov (%p454_p9), %v1769_v5  ;;  %v397_v6 = vmov (%p454_p9), %v1771_v6 }
 0x156   : >> { %v411_v5 = vmov (%p454_p9), %v1769_v5  ;;  %v414_v6 = vmov (%p454_p9), %v1771_v6 }
 0x157   : >>> { %v583_v61 = vadd.f32 1.0, %v582_v59  ;;  %v596_v62 = vsub.f32 %v521_v19, %v595_v60  ;;  %v598_v63 = vadd.f32 %v595_v60, %v525_v20  ;;  %v869_v19 = vld [vmem:[%s1850_s30] sm:$0xff] }
 0x158   : >>> { %v870_v20 = vld [vmem:[%s1853_s15] sm:$0xff] }
 0x159   : >>> { %1617 = vrsqrt.f32 %v583_v61  ;;  %600 = vst [vmem:[%s599_s27] sm:$0xff] %v596_v62  ;;  %vm590_vm5 = vweird.f32 %v583_v61  ;;  %s637_s27 = smov [#allocation21] }
 0x15a   : >>> { %602 = vst [vmem:[%s601_s28] sm:$0xff] %v598_v63  ;;  %s1843_s28 = smov [#allocation10] }
 0x15b   : >>> { %v645_v22 = vld [vmem:[%s1843_s28] sm:$0xff] }
 0x15f   : >>> { %v1618_v0 = vpop.eup %1617 }
 0x160   : >>> { %v585_v1 = vmul.f32 %v1618_v0, %v583_v61  ;;  %vm591_vm6 = vweird.f32 %v1618_v0 }
 0x161   : >>> { %vm592_vm7 = vmor %vm590_vm5, %vm591_vm6  ;;  %vm426_vm5 = vcmp.eq.s32.totalorder (%p454_p9), %v414_v6, %v411_v5 }
 0x162   : >>> { %v586_v2 = vmul.f32 %v1618_v0, %v585_v1 }
 0x164   : >>> { %v587_v3 = vmul.f32 0.5, %v586_v2 }
 0x166   : >>> { %v588_v4 = vsub.f32 1.5, %v587_v3 }
 0x168   : >>> { %v589_v7 = vmul.f32 %v1618_v0, %v588_v4 }
 0x16a   : >>> { %v593_v8 = vsel %vm592_vm7, %v1618_v0, %v589_v7 }
 0x16b   : >>> { %604 = vst [vmem:[%s603_s11] sm:$0xff] %v593_v8  ;;  %v594_v9 = vmul.f32 %v593_v8, %v581_v58  ;;  %s1845_s11 = smov [#allocation11] }
 0x16c   : >>> { %v646_v16 = vld [vmem:[%s1845_s11] sm:$0xff] }
 0x16d   : >>> { %606 = vst [vmem:[%s605_s21] sm:$0xff] %v594_v9  ;;  %s1847_s21 = smov [#allocation12] }
 0x16e   : >>> { %v647_v17 = vld [vmem:[%s1847_s21] sm:$0xff] }
 0x172   : >>> { %v608_v10 = vld [vmem:[%s607_s22] ss:$0 sm:$0xff]  ;;  %s861_s22 = smov [#allocation21] }
 0x173   : >>> { %v617_v11 = vsel %vm616_vm8, %v608_v10, 0.0 }
 0x174   : >>> { %618 = vadd.xlane.f32.xlu0 %v617_v11  ;;  %v623_v12 = vld [vmem:[%s622_s29] ss:$0 sm:$0xff]  ;;  %s1855_s29 = smov [#allocation13] }
 0x175   : >>> { %v632_v13 = vsel %vm631_vm9, %v623_v12, 0.0  ;;  %v648_v23 = vld [vmem:[%s1855_s29] sm:$0xff] }
 0x17c   : >>> { %633 = vadd.xlane.f32.xlu0 %v632_v13 }
 0x1e7   : >>> { %v619_v14 = vpop.xlane.xlu0 %618 }
 0x1e8   : >>> { %621 = vst [vmem:[%s620_s14] sm:$0xff] %v619_v14  ;;  %s639_s14 = smov [#allocation22] }
 0x1ef   : >>> { %v634_v15 = vpop.xlane.xlu0 %633  ;;  %v638_v18 = vld [vmem:[%s637_s27] sm:$0xff]  ;;  %s665_s27 = smov [#allocation19] }
 0x1f0   : >>> { %636 = vst [vmem:[%s635_s20] sm:$0xff] %v634_v15  ;;  %s863_s20 = smov [#allocation22]  ;;  %v862_v21 = vld [vmem:[%s861_s22] sm:$0xff]  ;;  %v652_v25 = vmul.f32 %v646_v16, %v638_v18  ;;  %v656_v26 = vmul.f32 %v647_v17, %v638_v18  ;;  %v649_v46 = vmul.f32 %v645_v22, %v638_v18  ;;  %v659_v48 = vmul.f32 %v648_v23, %v638_v18  ;;  %s667_s22 = smov [#allocation20] }
 0x1f1   : >>> { %v873_v30 = vmul.f32 %v869_v19, %v862_v21  ;;  %v876_v31 = vmul.f32 %v870_v20, %v862_v21  ;;  %v880_v38 = vmul.f32 %v871_v24, %v862_v21  ;;  %v883_v42 = vmul.f32 %v872_v29, %v862_v21  ;;  %v666_v52 = vld [vmem:[%s665_s27] ss:$0 sm:$0xff]  ;;  %s693_s27 = smov [#allocation10] }
 0x1f2   : >>> { %v668_v53 = vld [vmem:[%s667_s22] ss:$0 sm:$0xff]  ;;  %s734_s22 = smov [#allocation13] }
 0x1f7   : >>> { %v640_v27 = vld [vmem:[%s639_s14] sm:$0xff]  ;;  %s1877_s14 = smov [#allocation12] }
 0x1f8   : >>> { %v864_v28 = vld [vmem:[%s863_s20] sm:$0xff]  ;;  %v653_v32 = vmul.f32 %v648_v23, %v640_v27  ;;  %v655_v33 = vmul.f32 %v645_v22, %v640_v27  ;;  %v650_v39 = vmul.f32 %v647_v17, %v640_v27  ;;  %v658_v43 = vmul.f32 %v646_v16, %v640_v27  ;;  %s735_s20 = smov [#allocation18] }
 0x1f9   : >>> { %v874_v34 = vmul.f32 %v871_v24, %v864_v28  ;;  %v877_v35 = vmul.f32 %v872_v29, %v864_v28  ;;  %v879_v36 = vmul.f32 %v869_v19, %v864_v28  ;;  %v882_v37 = vmul.f32 %v870_v20, %v864_v28  ;;  %v742_v23 = vld [vmem:[%s735_s20] ss:$0 sm:$0xff]  ;;  %s1660_s20 = smov 1  }
 0x1fa   : >>> { %v654_v40 = vsub.f32 %v652_v25, %v653_v32  ;;  %v657_v41 = vadd.f32 %v656_v26, %v655_v33  ;;  %v651_v50 = vsub.f32 %v649_v46, %v650_v39  ;;  %v660_v51 = vadd.f32 %v659_v48, %v658_v43 }
 0x1fb   : >>> { %v875_v44 = vsub.f32 %v873_v30, %v874_v34  ;;  %v878_v45 = vsub.f32 %v876_v31, %v877_v35  ;;  %v881_v47 = vadd.f32 %v880_v38, %v879_v36  ;;  %v884_v49 = vadd.f32 %v883_v42, %v882_v37 }
 0x1fc   : >>> { %662 = vst [vmem:[%s1845_s11] sm:$0xff] %v654_v40  ;;  %s1879_s11 = smov [#allocation11] }
 0x1fd   : >>> { %663 = vst [vmem:[%s1847_s21] sm:$0xff] %v657_v41  ;;  %s1891_s21 = smov [#allocation10] }
 0x1fe   : >>> { %885 = vst [vmem:[%s1850_s30] sm:$0xff] %v875_v44  ;;  %s889_s30 = smov %s1776_s30 }
 0x1ff   : >>> { %886 = vst [vmem:[%s1853_s15] sm:$0xff] %v878_v45  ;;  %s1885_s15 = smov %s1781_s15 }
 0x200   : >>> { %887 = vst [vmem:[%s1858_s23] sm:$0xff] %v881_v47  ;;  %s890_s23 = smov %s1789_s23 }
 0x201   : >>> { %888 = vst [vmem:[%s1863_s24] sm:$0xff] %v884_v49  ;;  %s1895_s24 = smov %s1793_s24 }
 0x202   : >>> { %661 = vst [vmem:[%s1843_s28] sm:$0xff] %v651_v50  ;;  %s672_s28 = smov [#allocation13] }
 0x203   : >>> { %664 = vst [vmem:[%s1855_s29] sm:$0xff] %v660_v51  ;;  %v674_v55 = vld [vmem:[%s1879_s11] sm:$0xff]  ;;  %s694_s29 = smov [#allocation17] }
 0x204   : >>> { %v675_v54 = vld [vmem:[%s1877_s14] sm:$0xff]  ;;  %v678_v4 = vmul.f32 %v674_v55, %v668_v53  ;;  %v681_v12 = vmul.f32 %v674_v55, %v666_v52 }
 0x205   : >>> { %v891_v56 = vld [vmem:[%s889_s30] ss:$0 sm:$0xff]  ;;  %v1539_v58 = vld [vmem:[%s889_s30 + $0x7] ss:$0 sm:$0xff]  ;;  %v686_v9 = vmul.f32 %v675_v54, %v668_v53  ;;  %v683_v10 = vmul.f32 %v675_v54, %v666_v52 }
 0x206   : >>> { %v1538_v57 = vld [vmem:[%s889_s30 - $0x1] sm:$0xfe]  ;;  %v1543_v62 = vld [vmem:[%s1885_s15 + $0x7] ss:$0 sm:$0xff] }
 0x207   : >>> { %v898_v59 = vsel %vm821_vm10, %v891_v56, %v1538_v57  ;;  %v915_v60 = vld [vmem:[%s1885_s15] ss:$0 sm:$0xff]  ;;  %v1541_v0 = vld [vmem:[%s890_s23 + $0x1] sm:$0x7f] }
 0x208   : >>> { %v1542_v61 = vld [vmem:[%s1885_s15 - $0x1] sm:$0xfe]  ;;  %901 = vst [vmem:[%s889_s30] sm:$0xff] %v898_v59  ;;  %v910_v2 = vsel %vm833_vm11, %v1539_v58, %v1541_v0 }
 0x209   : >>> { %v902_v63 = vld [vmem:[%s890_s23] ss:$0 sm:$0xff]  ;;  %v922_v1 = vsel %vm821_vm10, %v915_v60, %v1542_v61  ;;  %v1545_v3 = vld [vmem:[%s1895_s24 + $0x1] sm:$0x7f] }
 0x20a   : >>> { %1540 = vst [vmem:[%s889_s30 + $0x1] sm:$0x1] %v902_v63  ;;  %v926_v7 = vld [vmem:[%s1895_s24] ss:$0 sm:$0xff]  ;;  %v934_v8 = vsel %vm833_vm11, %v1543_v62, %v1545_v3 }
 0x20b   : >>> { %912 = vst [vmem:[%s890_s23] sm:$0xff] %v910_v2  ;;  %v673_v11 = vld [vmem:[%s1891_s21] sm:$0xff] }
 0x20c   : >>> { %925 = vst [vmem:[%s1885_s15] sm:$0xff] %v922_v1  ;;  %v676_v13 = vld [vmem:[%s672_s28] sm:$0xff]  ;;  %v677_v14 = vmul.f32 %v673_v11, %v666_v52  ;;  %v680_v15 = vmul.f32 %v673_v11, %v668_v53 }
 0x20d   : >>> { %1544 = vst [vmem:[%s1885_s15 + $0x1] sm:$0x1] %v926_v7  ;;  %v684_v16 = vmul.f32 %v676_v13, %v668_v53  ;;  %v687_v17 = vmul.f32 %v676_v13, %v666_v52  ;;  %v701_v22 = vld [vmem:[%s694_s29] ss:$0 sm:$0xff]  ;;  %s1929_s29 = smov [#allocation12] }
 0x20e   : >>> { %936 = vst [vmem:[%s1895_s24] sm:$0xff] %v934_v8  ;;  %v679_v18 = vsub.f32 %v677_v14, %v678_v4  ;;  %v682_v21 = vadd.f32 %v681_v12, %v680_v15 }
 0x20f   : >>> { %v688_v19 = vadd.f32 %v687_v17, %v686_v9  ;;  %v685_v20 = vsub.f32 %v683_v10, %v684_v16 }
 0x210   : >>> { %689 = vst [vmem:[%s1891_s21] sm:$0xff] %v679_v18  ;;  %s708_s21 = smov [#allocation11] }
 0x211   : >>> { %692 = vst [vmem:[%s672_s28] sm:$0xff] %v688_v19  ;;  %s1927_s28 = smov [#allocation13] }
 0x212   : >>> { %691 = vst [vmem:[%s1877_s14] sm:$0xff] %v685_v20  ;;  %s721_s14 = smov [#allocation12] }
 0x213   : >>> { %690 = vst [vmem:[%s1879_s11] sm:$0xff] %v682_v21  ;;  %s1925_s11 = smov [#allocation10] }
 0x217   : >>> { %v702_v24 = vld [vmem:[%s693_s27] sm:$0xff] }
 0x218   : >>> { %v743_v25 = vld [vmem:[%s734_s22] sm:$0xff]  ;;  %v706_v26 = vsel %vm705_vm12, %v701_v22, %v702_v24 }
 0x219   : >>> { %v747_v27 = vsel %vm746_vm13, %v742_v23, %v743_v25  ;;  %v728_v28 = vld [vmem:[%s721_s14] sm:$0xff]  ;;  %707 = vst [vmem:[%s693_s27] sm:$0xff] %v706_v26  ;;  %s750_s27 = smov [#allocation11] }
 0x21a   : >>> { %748 = vst [vmem:[%s734_s22] sm:$0xff] %v747_v27  ;;  %v732_v29 = vsel %vm731_vm14, 0.0, %v728_v28  ;;  %v715_v30 = vld [vmem:[%s708_s21] sm:$0xff]  ;;  %s1661_s22 = smov 127  }
 0x21b   : >>> { %733 = vst [vmem:[%s721_s14] sm:$0xff] %v732_v29  ;;  %v719_v31 = vsel %vm718_vm15, 0.0, %v715_v30  ;;  %s1937_s14 = smov [#allocation11] }
 0x21c   : >>> { %720 = vst [vmem:[%s708_s21] sm:$0xff] %v719_v31  ;;  %s814_s21 = smov [#allocation12] }
 0x220   : >>> { %v755_v32 = vld [vmem:[%s1925_s11] sm:$0xff] }
 0x221   : >>> { %v783_v33 = vld [vmem:[%s1927_s28] sm:$0xff]  ;;  %756 = vrot.lane.b32.xlu1 %v755_v32, %s1660_s20 }
 0x222   : >>> { %784 = vrot.lane.b32.xlu0 %v783_v33, %s1660_s20  ;;  %v787_v34 = vld [vmem:[%s1929_s29] sm:$0xff] }
 0x223   : >>> { %788 = vrot.lane.b32.xlu2 %v787_v34, %s1660_s20  ;;  %v772_v35 = vld [vmem:[%s750_s27] sm:$0xff] }
 0x229   : >>> { %752 = vrot.lane.b32.xlu1 %v772_v35, %s1660_s20  ;;  %s813_s20 = smov [#allocation10] }
 0x22b   : >>> { %773 = vrot.lane.b32.xlu2 %v772_v35, %s1661_s22 }
 0x231   : >>> { %805 = vrot.lane.b32.xlu1 %v783_v33, %s1661_s22  ;;  %s398_s22 = smov (%p454_p9), [#allocation12] }
 0x27d   : >>> { %v789_v36 = vpop.permute.xlu2 %788 }
 0x27e   : >>> { %v793_v44 = vsel %vm760_vm1, %v787_v34, %v789_v36 }
 0x285   : >>> { %v774_v37 = vpop.permute.xlu2 %773 }
 0x286   : >>> { %v778_v38 = vsel %vm777_vm0, %v755_v32, %v774_v37 }
 0x287   : >>> { %780 = vst [vmem:[%s750_s27] sm:$0xff] %v778_v38  ;;  %s381_s27 = smov (%p454_p9), [#allocation11] }
 0x28e   : >>> { %v839_v39 = vld [vmem:[%s1937_s14] ss:$0 sm:$0xff]  ;;  %v1535_v41 = vld [vmem:[%s1937_s14 + $0x7] ss:$0 sm:$0xff] }
 0x28f   : >>> { %v1534_v40 = vld [vmem:[%s1937_s14 - $0x1] sm:$0xfe] }
 0x290   : >>> { %v846_v42 = vsel %vm821_vm10, %v839_v39, %v1534_v40 }
 0x291   : >>> { %849 = vst [vmem:[%s1937_s14] sm:$0xff] %v846_v42 }
 0x293   : >>> { %v757_v43 = vpop.permute.xlu1 %756 }
 0x294   : >>> { %v785_v45 = vpop.permute.xlu0 %784  ;;  %v761_v48 = vsel %vm760_vm1, %v755_v32, %v757_v43 }
 0x295   : >>> { %v797_v46 = vsel %vm764_vm3, %v785_v45, %v793_v44 }
 0x296   : >>> { %v803_v47 = vsel %vm1399_vm2, %v797_v46, 0.0 }
 0x297   : >>> { %811 = vst [vmem:[%s1929_s29] sm:$0xff] %v803_v47  ;;  %s362_s29 = smov (%p454_p9), [#allocation10] }
 0x29b   : >>> { %v753_v49 = vpop.permute.xlu1 %752 }
 0x29c   : >>> { %v765_v50 = vsel %vm764_vm3, %v753_v49, %v761_v48 }
 0x29d   : >>> { %v771_v51 = vsel %vm1399_vm2, %v765_v50, 0.0 }
 0x29e   : >>> { %779 = vst [vmem:[%s1925_s11] sm:$0xff] %v771_v51  ;;  %v1533_v53 = vld [vmem:[%s814_s21 + $0x1] sm:$0x7f]  ;;  %v826_v60 = vld [vmem:[%s814_s21] ss:$0 sm:$0xff]  ;;  %s838_s11 = smov [#allocation13] }
 0x2a3   : >>> { %v806_v52 = vpop.permute.xlu1 %805 }
 0x2a4   : >>> { %v810_v54 = vsel %vm777_vm0, %v787_v34, %v806_v52 }
 0x2a5   : >>> { %v815_v55 = vld [vmem:[%s813_s20] ss:$0 sm:$0xff]  ;;  %v1531_v57 = vld [vmem:[%s813_s20 + $0x7] ss:$0 sm:$0xff]  ;;  %812 = vst [vmem:[%s1927_s28] sm:$0xff] %v810_v54  ;;  %s937_s28 = sadd.s32 (%p454_p9), 1, %s1653_s16  }
 0x2a6   : >>> { %v1530_v56 = vld [vmem:[%s813_s20 - $0x1] sm:$0xfe]  ;;  %v834_v59 = vsel %vm833_vm11, %v1531_v57, %v1533_v53  ;;  %p450_p10 = scmp.ge.s32.totalorder (%p454_p9), %s937_s28, 15  ;;  %s2054_s16 = smov (%p454_p9), %s937_s28 }
 0x2a7   : >>> { %v822_v58 = vsel %vm821_vm10, %v815_v55, %v1530_v56  ;;  %836 = vst [vmem:[%s814_s21] sm:$0xff] %v834_v59 }
 0x2a8   : >>> { %825 = vst [vmem:[%s813_s20] sm:$0xff] %v822_v58 }
 0x2a9   : >>> { %1532 = vst [vmem:[%s813_s20 + $0x1] sm:$0x1] %v826_v60 }
 0x2ac   : >>> { %v850_v61 = vld [vmem:[%s838_s11] ss:$0 sm:$0xff]  ;;  %v1537_v62 = vld [vmem:[%s838_s11 + $0x1] sm:$0x7f] }
 0x2ad   : >>> { %1536 = vst [vmem:[%s1937_s14 + $0x1] sm:$0x1] %v850_v61  ;;  %v858_v63 = vsel %vm833_vm11, %v1535_v41, %v1537_v62  ;;  %456 = sbr.rel (!%p454_p9) target bundleno = 248 (0xf8), region = 502  ;;  %s415_s14 = smov (%p454_p9), [#allocation13] }
 0x2ae   : >>> { %860 = vst [vmem:[%s838_s11] sm:$0xff] %v858_v63  ;;  %v404_v4 = vld [vmem:[%s398_s22] sm:$0xff] (%p454_p9) }
 0x2af   : >> { %v405_v10 = vsel (%p454_p9), %vm1399_vm2, %v404_v4, 0.0 }
 0x2b0   : >> { %v368_v0 = vld [vmem:[%s362_s29] sm:$0xff] (%p454_p9)  ;;  %v406_v12 = vmul.f32 (%p454_p9), %v405_v10, %v405_v10 }
 0x2b1   : >> { %v369_v2 = vsel (%p454_p9), %vm1399_vm2, %v368_v0, 0.0 }
 0x2b2   : >> { %v370_v8 = vmul.f32 %v369_v2, %v369_v2 }
 0x2b4   : >> { %v387_v1 = vld [vmem:[%s381_s27] sm:$0xff]  ;;  %v374_v15 = vsel %vm373_vm4, 0.0, %v370_v8 }
 0x2b5   : >> { %v388_v3 = vsel %vm1399_vm2, %v387_v1, 0.0  ;;  %v421_v7 = vld [vmem:[%s415_s14] sm:$0xff] }
 0x2b6   : >> { %v389_v9 = vmul.f32 %v388_v3, %v388_v3  ;;  %v422_v11 = vsel %vm1399_vm2, %v421_v7, 0.0 }
 0x2b7   : >> { %v423_v14 = vmul.f32 %v422_v11, %v422_v11 }
 0x2b8   : >> { %v391_v13 = vadd.f32 %v389_v9, %v370_v8  ;;  %v390_v17 = vadd.f32 %v389_v9, %v374_v15 }
 0x2b9   : >> { %v427_v20 = vsel %vm426_vm5, 0.0, %v423_v14 }
 0x2ba   : >> { %v408_v16 = vadd.f32 %v406_v12, %v391_v13  ;;  %v407_v19 = vadd.f32 %v406_v12, %v390_v17 }
 0x2bc   : >> { %v429_v18 = vadd.f32 %v423_v14, %v408_v16  ;;  %v428_v21 = vadd.f32 %v427_v20, %v407_v19 }
 0x2be   : >> { %430 = vadd.xlane.f32.xlu0 %v429_v18 }
 0x2c6   : >> { %438 = vadd.xlane.f32.xlu0 %v428_v21 }
 0x331   : >> { %v431_v22 = vpop.xlane.xlu0 %430 }
 0x332   : >> { %v432_v23 = vrot.slane %v431_v22, 4 }
 0x334   : >> { %v433_v24 = vadd.f32 %v432_v23, %v431_v22 }
 0x336   : >> { %v434_v25 = vrot.slane %v433_v24, 2 }
 0x338   : >> { %v435_v29 = vadd.f32 %v434_v25, %v433_v24 }
 0x339   : >> { %v439_v26 = vpop.xlane.xlu0 %438 }
 0x33a   : >> { %v440_v27 = vrot.slane %v439_v26, 4  ;;  %v436_v32 = vrot.slane %v435_v29, 1 }
 0x33c   : >> { %v441_v28 = vadd.f32 %v440_v27, %v439_v26  ;;  %v437_v35 = vadd.f32 %v436_v32, %v435_v29 }
 0x33e   : >> { %v442_v30 = vrot.slane %v441_v28, 2 }
 0x340   : >> { %v443_v31 = vadd.f32 %v442_v30, %v441_v28 }
 0x342   : >> { %v444_v33 = vrot.slane %v443_v31, 1 }
 0x344   : >> { %v445_v34 = vadd.f32 %v444_v33, %v443_v31 }
 0x346   : >> { %1564 = vpush %v445_v34 }
 0x347   : >> { %1566 = vpush %v437_v35 }
 0x377   : >> { %s1565_s17 = spop %1564 }
 0x378   : >> { %s1567_s21 = spop %1566 }
 0x379   : >> { %s448_s20 = smul.f32 1e-10, %s1567_s21 }
 0x37b   : >> { %p449_p11 = scmp.le.f32.partialorder %s1565_s17, %s448_s20 }
 0x37d   : >> { %p451_p12 = por %p450_p10, %p449_p11 }
 0x37f   : > { %939 = sbr.rel (!%p451_p12) target bundleno = 247 (0xf7), region = 513 }
 0x384 PF: > { %s944_s11 = smov [#allocation10]  ;;  %v948_v5 = vmov %v1769_v5  ;;  %v951_v6 = vmov %v1771_v6  ;;  %s964_s16 = smov [#allocation13] }
 0x385   : > { %v968_v5 = vmov %v1769_v5  ;;  %v971_v6 = vmov %v1771_v6  ;;  %v952_v36 = vld [vmem:[%s944_s11] sm:$0xff]  ;;  %vm955_vm6 = vcmp.eq.s32.totalorder %v951_v6, %v948_v5  ;;  %s940_s28 = sand.u32 7, %s1728_s12   ;;  %s1011_s22 = sshrl.u32 (%p1742_p3), %s1728_s12, 3 }
 0x386   : > { %vm975_vm7 = vcmp.eq.s32.totalorder %v971_v6, %v968_v5  ;;  %v956_v37 = vsel %vm955_vm6, %v952_v36, 0.0  ;;  %v972_v39 = vld [vmem:[%s964_s16] sm:$0xff]  ;;  %s941_s29 = scalar_lea.vmem %s287_s25, %s940_s28 [#allocation4]  ;;  %s943_s27 = scalar_lea.vmem %s293_s26, %s940_s28 [#allocation5] }
 0x387   : > { %v957_v38 = vrot.slane %v956_v37, 4  ;;  %v976_v40 = vsel %vm975_vm7, %v972_v39, 0.0  ;;  %s945_s29 = smov %s941_s29  ;;  %s965_s27 = smov %s943_s27 }
 0x388   : > { %v977_v42 = vrot.slane %v976_v40, 4  ;;  %s1552_s14 = sshll.u32 (%p1742_p3), %s1011_s22, 3 }
 0x389   : > { %v958_v41 = vadd.f32 %v957_v38, %v956_v37  ;;  %s1013_s20 = scalar_lea.vmem (%p1742_p3), %s2046_s4, %s1552_s14 }
 0x38a   : > { %v978_v44 = vadd.f32 %v977_v42, %v976_v40 }
 0x38b   : > { %v959_v43 = vrot.slane %v958_v41, 2 }
 0x38c   : > { %v979_v46 = vrot.slane %v978_v44, 2 }
 0x38d   : > { %v960_v45 = vadd.f32 %v959_v43, %v958_v41 }
 0x38e   : > { %v980_v48 = vadd.f32 %v979_v46, %v978_v44 }
 0x38f   : > { %v961_v47 = vrot.slane %v960_v45, 1 }
 0x390   : > { %v981_v6 = vrot.slane %v980_v48, 1  ;;  %1010 = sbr.rel (!%p1742_p3) target bundleno = 924 (0x39c), region = 174 }
 0x391   : > { %v962_v5 = vadd.f32 %v961_v47, %v960_v45 }
 0x392   : > { %v982_v49 = vadd.f32 %v981_v6, %v980_v48 }
 0x393   : > { %963 = vst [vmem:[%s945_s29] sm:$0x1] %v962_v5 }
 0x394   : > { %983 = vst [vmem:[%s965_s27] sm:$0x1] %v982_v49 }
 0x39a   : > { %v1042_v50 = vld [vmem:[%s287_s25] sm:$0xff] }
 0x39b   : > { %1043 = vst [vmem:[%s1013_s20] sm:$0xff] %v1042_v50 }
 0x39c PF: > { %1049 = sbr.rel (!%p1742_p3) target bundleno = 932 (0x3a4), region = 212  ;;  %s1050_s11 = sshrl.u32 (%p1742_p3), %s1728_s12, 3 }
 0x39d   : > { %s1553_s16 = sshll.u32 (%p1742_p3), %s1050_s11, 3 }
 0x39e   : > { %s1052_s25 = scalar_lea.vmem (%p1742_p3), %s2047_s5, %s1553_s16 }
 0x3a2   : > { %v1081_v51 = vld [vmem:[%s293_s26] sm:$0xff] }
 0x3a3   : > { %1082 = vst [vmem:[%s1052_s25] sm:$0xff] %v1081_v51 }
 0x3a4 PF: > { %s1554_s27 = sshll.u32 %s1728_s12, 3  ;;  %v1116_v52 = vld [vmem:[%s1776_s30] sm:$0xff]  ;;  %v1151_v53 = vld [vmem:[%s1781_s15] sm:$0xff] }
 0x3a5   : > { %s1087_s18 = scalar_lea.vmem %s2048_s6, %s1554_s27  ;;  %s1122_s17 = scalar_lea.vmem %s2049_s7, %s1554_s27  ;;  %v1186_v54 = vld [vmem:[%s1789_s23] sm:$0xff]  ;;  %v1221_v55 = vld [vmem:[%s1793_s24] sm:$0xff] }
 0x3a6   : > { %1117 = vst [vmem:[%s1087_s18] sm:$0xff] %v1116_v52  ;;  %s1157_s11 = scalar_lea.vmem %s2050_s8, %s1554_s27  ;;  %s1192_s12 = scalar_lea.vmem %s2051_s9, %s1554_s27 }
 0x3a7   : > { %1152 = vst [vmem:[%s1122_s17] sm:$0xff] %v1151_v53 }
 0x3a8   : > { %1187 = vst [vmem:[%s1157_s11] sm:$0xff] %v1186_v54 }
 0x3a9   : > { %1222 = vst [vmem:[%s1192_s12] sm:$0xff] %v1221_v55 }
 0x3aa PF: > { %s2055_s15 = sld [smem:[#allocation23_spill]]  ;;  %p13_p13 = scmp.ge.s32.totalorder %s1731_s13, 10  }
 0x3ab   : > { %s2056_s30 = smov %s1645_s10  ;;  %s2058_s11 = smov %s1731_s13 }
 0x3ac   :  { %15 = sbr.rel (!%p13_p13) target bundleno = 2 (0x2), region = 524 }
 0x3b0   : > { %s2057_s10 = smov %s2055_s15 }

// kernel: riemannian_batch_norm_fwd.4
= control target key start
LH: loop header
LB: loop body
LE: loop exit
PB: predicated region body
PF: predicated region fallthrough
CT: control target
= control target key end

     0   :  { %v197_v2 = vmov 0.0   ;;  %s198_s13 = smov 112   ;;  %s199_s14 = smov 96   ;;  %vm29_vm0 = vcmask 130048   ;;  %vm76_vm1 = vcmask 786048   ;;  %vm58_vm2 = vcmask 523648   ;;  %s246_s1 = inlined_call_operand.vmem [shape: f32[16,16], index: 1, kind: input, shape index: {}]   ;;  %s247_s0 = inlined_call_operand.vmem [shape: f32[16,128], index: 0, kind: input, shape index: {}]   ;;  %s248_s2 = inlined_call_operand.vmem [shape: f32[16,128], index: 2, kind: output, shape index: {}]  }
   0x1   :  { %v12_v0 = vld [vmem:[%s246_s1 + $0x8] sm:$0xff]  ;;  %13 = vst [vmem:[#allocation2] sm:$0xff] %v197_v2  ;;  %v11_v3 = vld [vmem:[%s246_s1] sm:$0xff]  ;;  %s200_s19 = smov 80   ;;  %s202_s1 = smov 48   ;;  %vm94_vm3 = vcmask 1048448  }
   0x2   :  { %v98_v1 = vld [vmem:[%s247_s0 + $0x8] sm:$0xff]  ;;  %90 = vrot.lane.b32.xlu0 %v12_v0, %s198_s13  ;;  %81 = vrot.lane.b32.xlu1 %v12_v0, %s199_s14  ;;  %v97_v4 = vld [vmem:[%s247_s0] sm:$0xff]  ;;  %14 = vst [vmem:[#allocation2 + $0x8] sm:$0xff] %v197_v2  ;;  %s201_s0 = smov 64   ;;  %s203_s20 = smov 32   ;;  %vm85_vm4 = vcmask 917248  }
   0x3   :  { %117 = vmatpush.msra.mxu0 %v98_v1  ;;  %30 = vst.msk [vmem:[#allocation2] sm:$0xff] %vm29_vm0, %v11_v3  ;;  %72 = vrot.lane.b32.xlu2 %v12_v0, %s200_s19  ;;  %s204_s21 = smov 16   ;;  %vm49_vm5 = vcmask 392448   ;;  %vm67_vm6 = vcmask 654848   ;;  %vm40_vm7 = vcmask 261248  }
   0x4   :  { %31 = vst.msk [vmem:[#allocation2 + $0x8] sm:$0xff] %vm29_vm0, %v12_v0 }
   0x5   :  { %118 = vmatpush.msra.mxu0 %v97_v4  ;;  %15 = vst [vmem:[#allocation2 + $0x10] sm:$0xff] %v197_v2 }
   0x6   :  { %171 = vmatmul.msk.f32.vlgmr.msra.gmra.mxu0 %vm29_vm0, %v11_v3  ;;  %16 = vst [vmem:[#allocation2 + $0x18] sm:$0xff] %v197_v2 }
   0x7   :  { %17 = vst [vmem:[#allocation2 + $0x20] sm:$0xff] %v197_v2 }
   0x8   :  { %18 = vst [vmem:[#allocation2 + $0x28] sm:$0xff] %v197_v2 }
   0x9   :  { %19 = vst [vmem:[#allocation2 + $0x30] sm:$0xff] %v197_v2 }
   0xa   :  { %88 = vrot.lane.b32.xlu0 %v11_v3, %s198_s13  ;;  %79 = vrot.lane.b32.xlu1 %v11_v3, %s199_s14  ;;  %20 = vst [vmem:[#allocation2 + $0x38] sm:$0xff] %v197_v2  ;;  %v126_v35 = vld [vmem:[#allocation2] sm:$0xff] }
   0xb   :  { %21 = vst [vmem:[#allocation2 + $0x40] sm:$0xff] %v197_v2  ;;  %70 = vrot.lane.b32.xlu2 %v11_v3, %s200_s19  ;;  %v127_v34 = vld [vmem:[#allocation2 + $0x8] sm:$0xff] }
   0xc   :  { %22 = vst [vmem:[#allocation2 + $0x48] sm:$0xff] %v197_v2 }
   0xd   :  { %23 = vst [vmem:[#allocation2 + $0x50] sm:$0xff] %v197_v2 }
   0xe   :  { %24 = vst [vmem:[#allocation2 + $0x58] sm:$0xff] %v197_v2  ;;  %172 = vmatmul.msk.f32.gmra.mxu0 %vm29_vm0, %v12_v0 }
   0xf   :  { %25 = vst [vmem:[#allocation2 + $0x60] sm:$0xff] %v197_v2 }
  0x10   :  { %26 = vst [vmem:[#allocation2 + $0x68] sm:$0xff] %v197_v2 }
  0x11   :  { %27 = vst [vmem:[#allocation2 + $0x70] sm:$0xff] %v197_v2 }
  0x12   :  { %63 = vrot.lane.b32.xlu0 %v12_v0, %s201_s0  ;;  %61 = vrot.lane.b32.xlu1 %v11_v3, %s201_s0  ;;  %28 = vst [vmem:[#allocation2 + $0x78] sm:$0xff] %v197_v2 }
  0x13   :  { %54 = vrot.lane.b32.xlu2 %v12_v0, %s202_s1 }
  0x1a   :  { %52 = vrot.lane.b32.xlu0 %v11_v3, %s202_s1  ;;  %45 = vrot.lane.b32.xlu1 %v12_v0, %s203_s20 }
  0x1b   :  { %43 = vrot.lane.b32.xlu2 %v11_v3, %s203_s20 }
  0x22   :  { %36 = vrot.lane.b32.xlu0 %v12_v0, %s204_s21  ;;  %34 = vrot.lane.b32.xlu1 %v11_v3, %s204_s21 }
  0x5d   :  { %v73_v5 = vpop.permute.xlu2 %72 }
  0x5e   :  { %78 = vst.msk [vmem:[#allocation2 + $0x58] sm:$0xff] %vm76_vm1, %v73_v5 }
  0x65   :  { %v71_v6 = vpop.permute.xlu2 %70  ;;  %v137_v19 = vld [vmem:[#allocation2 + $0x58] sm:$0xff] }
  0x66   :  { %77 = vst.msk [vmem:[#allocation2 + $0x50] sm:$0xff] %vm76_vm1, %v71_v6 }
  0x6d   :  { %v55_v7 = vpop.permute.xlu2 %54  ;;  %v136_v21 = vld [vmem:[#allocation2 + $0x50] sm:$0xff] }
  0x6e   :  { %60 = vst.msk [vmem:[#allocation2 + $0x38] sm:$0xff] %vm58_vm2, %v55_v7 }
  0x74   :  { %v91_v8 = vpop.permute.xlu0 %90  ;;  %v82_v9 = vpop.permute.xlu1 %81 }
  0x75   :  { %96 = vst.msk [vmem:[#allocation2 + $0x78] sm:$0xff] %vm94_vm3, %v91_v8  ;;  %v44_v10 = vpop.permute.xlu2 %43  ;;  %v133_v25 = vld [vmem:[#allocation2 + $0x38] sm:$0xff] }
  0x76   :  { %87 = vst.msk [vmem:[#allocation2 + $0x68] sm:$0xff] %vm85_vm4, %v82_v9 }
  0x77   :  { %50 = vst.msk [vmem:[#allocation2 + $0x20] sm:$0xff] %vm49_vm5, %v44_v10 }
  0x7c   :  { %v89_v11 = vpop.permute.xlu0 %88  ;;  %v141_v12 = vld [vmem:[#allocation2 + $0x78] sm:$0xff]  ;;  %v80_v13 = vpop.permute.xlu1 %79 }
  0x7d   :  { %95 = vst.msk [vmem:[#allocation2 + $0x70] sm:$0xff] %vm94_vm3, %v89_v11  ;;  %142 = vmatpush.msra.mxu1 %v141_v12  ;;  %173 = vmatpush.msra.mxu2 %v141_v12  ;;  %v139_v17 = vld [vmem:[#allocation2 + $0x68] sm:$0xff] }
  0x7e   :  { %86 = vst.msk [vmem:[#allocation2 + $0x60] sm:$0xff] %vm85_vm4, %v80_v13  ;;  %v130_v30 = vld [vmem:[#allocation2 + $0x20] sm:$0xff] }
  0x83   :  { %v120_v31 = vpop.f32.mrf.mxu0 }
  0x84   :  { %v64_v14 = vpop.permute.xlu0 %63  ;;  %v140_v15 = vld [vmem:[#allocation2 + $0x70] sm:$0xff]  ;;  %v62_v16 = vpop.permute.xlu1 %61 }
  0x85   :  { %69 = vst.msk [vmem:[#allocation2 + $0x48] sm:$0xff] %vm67_vm6, %v64_v14  ;;  %143 = vmatpush.msra.mxu1 %v140_v15  ;;  %174 = vmatpush.msra.mxu2 %v140_v15  ;;  %v138_v18 = vld [vmem:[#allocation2 + $0x60] sm:$0xff] }
  0x86   :  { %68 = vst.msk [vmem:[#allocation2 + $0x40] sm:$0xff] %vm67_vm6, %v62_v16 }
  0x87   :  { %144 = vmatpush.msra.mxu1 %v139_v17  ;;  %175 = vmatpush.msra.mxu2 %v139_v17 }
  0x89   :  { %145 = vmatpush.msra.mxu1 %v138_v18  ;;  %176 = vmatpush.msra.mxu2 %v138_v18 }
  0x8b   :  { %146 = vmatpush.msra.mxu1 %v137_v19  ;;  %177 = vmatpush.msra.mxu2 %v137_v19  ;;  %v123_v36 = vpop.f32.mrf.mxu0 }
  0x8c   :  { %v53_v20 = vpop.permute.xlu0 %52  ;;  %v46_v22 = vpop.permute.xlu1 %45  ;;  %v135_v23 = vld [vmem:[#allocation2 + $0x48] sm:$0xff] }
  0x8d   :  { %59 = vst.msk [vmem:[#allocation2 + $0x30] sm:$0xff] %vm58_vm2, %v53_v20  ;;  %147 = vmatpush.msra.mxu1 %v136_v21  ;;  %178 = vmatpush.msra.mxu2 %v136_v21  ;;  %v134_v24 = vld [vmem:[#allocation2 + $0x40] sm:$0xff] }
  0x8e   :  { %51 = vst.msk [vmem:[#allocation2 + $0x28] sm:$0xff] %vm49_vm5, %v46_v22 }
  0x8f   :  { %148 = vmatpush.msra.mxu1 %v135_v23  ;;  %179 = vmatpush.msra.mxu2 %v135_v23 }
  0x91   :  { %149 = vmatpush.msra.mxu1 %v134_v24  ;;  %180 = vmatpush.msra.mxu2 %v134_v24 }
  0x93   :  { %150 = vmatpush.msra.mxu1 %v133_v25  ;;  %181 = vmatpush.msra.mxu2 %v133_v25 }
  0x94   :  { %v37_v26 = vpop.permute.xlu0 %36  ;;  %v132_v27 = vld [vmem:[#allocation2 + $0x30] sm:$0xff]  ;;  %v35_v28 = vpop.permute.xlu1 %34 }
  0x95   :  { %42 = vst.msk [vmem:[#allocation2 + $0x18] sm:$0xff] %vm40_vm7, %v37_v26  ;;  %151 = vmatpush.msra.mxu1 %v132_v27  ;;  %182 = vmatpush.msra.mxu2 %v132_v27  ;;  %v131_v29 = vld [vmem:[#allocation2 + $0x28] sm:$0xff] }
  0x96   :  { %41 = vst.msk [vmem:[#allocation2 + $0x10] sm:$0xff] %vm40_vm7, %v35_v28 }
  0x97   :  { %152 = vmatpush.msra.mxu1 %v131_v29  ;;  %183 = vmatpush.msra.mxu2 %v131_v29 }
  0x99   :  { %153 = vmatpush.msra.mxu1 %v130_v30  ;;  %184 = vmatpush.msra.mxu2 %v130_v30 }
  0x9c   :  { %v129_v32 = vld [vmem:[#allocation2 + $0x18] sm:$0xff] }
  0x9d   :  { %154 = vmatpush.msra.mxu1 %v129_v32  ;;  %185 = vmatpush.msra.mxu2 %v129_v32  ;;  %v128_v33 = vld [vmem:[#allocation2 + $0x10] sm:$0xff] }
  0x9f   :  { %155 = vmatpush.msra.mxu1 %v128_v33  ;;  %186 = vmatpush.msra.mxu2 %v128_v33 }
  0xa1   :  { %156 = vmatpush.msra.mxu1 %v127_v34  ;;  %187 = vmatpush.msra.mxu2 %v127_v34 }
  0xa3   :  { %157 = vmatpush.msra.mxu1 %v126_v35  ;;  %188 = vmatpush.msra.mxu2 %v126_v35 }
  0xa4   :  { %158 = vmatmul.f32.vlgmr.msra.gmra.mxu1 %v120_v31  ;;  %161 = vmatmul.f32.vlgmr.msra.gmra.mxu2 %v123_v36 }
 0x121   :  { %v159_v37 = vpop.f32.mrf.mxu1 }
 0x122   :  { %165 = vst [vmem:[%s248_s2] sm:$0xff] %v159_v37 }
 0x127   :  { %v162_v38 = vpop.f32.mrf.mxu2 }
 0x128   :  { %166 = vst [vmem:[%s248_s2 + $0x8] sm:$0xff] %v162_v38 }

// kernel: riemannian_batch_norm_fwd.5
= control target key start
LH: loop header
LB: loop body
LE: loop exit
PB: predicated region body
PF: predicated region fallthrough
CT: control target
= control target key end

     0   :  { %s264_s16 = smov 112   ;;  %s265_s17 = smov 96   ;;  %v266_v2 = vmov 0.0   ;;  %vm97_vm0 = vcmask 786048   ;;  %vm71_vm1 = vcmask 523648   ;;  %vm123_vm2 = vcmask 1048448   ;;  %s395_s1 = inlined_call_operand.vmem [shape: f32[128,16], index: 1, kind: input, shape index: {}]   ;;  %s396_s2 = inlined_call_operand.vmem [shape: f32[1,128], index: 2, kind: input, shape index: {}]   ;;  %s397_s0 = inlined_call_operand.vmem [shape: f32[16,128], index: 0, kind: input, shape index: {}]   ;;  %s398_s3 = inlined_call_operand.vmem [shape: f32[16,16], index: 3, kind: output, shape index: {}]  }
   0x1   :  { %v114_v0 = vld [vmem:[%s395_s1 + $0x78] sm:$0xff]  ;;  %v101_v1 = vld [vmem:[%s395_s1 + $0x68] sm:$0xff]  ;;  %29 = vst [vmem:[#allocation2 + $0x78] sm:$0xff] %v266_v2  ;;  %s267_s20 = smov 80   ;;  %v113_v4 = vld [vmem:[%s395_s1 + $0x70] sm:$0xff]  ;;  %s268_s4 = smov 64  }
   0x2   :  { %119 = vrot.lane.b32.xlu0 %v114_v0, %s264_s16  ;;  %106 = vrot.lane.b32.xlu1 %v101_v1, %s265_s17  ;;  %v88_v3 = vld [vmem:[%s395_s1 + $0x58] sm:$0xff]  ;;  %14 = vst [vmem:[#allocation2] sm:$0xff] %v266_v2  ;;  %v100_v5 = vld [vmem:[%s395_s1 + $0x60] sm:$0xff]  ;;  %s269_s7 = smov 48   ;;  %s270_s12 = smov 32   ;;  %vm110_vm3 = vcmask 917248  }
   0x3   :  { %93 = vrot.lane.b32.xlu2 %v88_v3, %s267_s20  ;;  %15 = vst [vmem:[#allocation2 + $0x8] sm:$0xff] %v266_v2  ;;  %v87_v6 = vld [vmem:[%s395_s1 + $0x50] sm:$0xff]  ;;  %v75_v7 = vld [vmem:[%s395_s1 + $0x48] sm:$0xff]  ;;  %v74_v8 = vld [vmem:[%s395_s1 + $0x40] sm:$0xff]  ;;  %s271_s22 = smov 16   ;;  %vm58_vm4 = vcmask 392448  }
   0x4   :  { %16 = vst [vmem:[#allocation2 + $0x10] sm:$0xff] %v266_v2  ;;  %v62_v9 = vld [vmem:[%s395_s1 + $0x38] sm:$0xff]  ;;  %v61_v10 = vld [vmem:[%s395_s1 + $0x30] sm:$0xff]  ;;  %v49_v11 = vld [vmem:[%s395_s1 + $0x28] sm:$0xff]  ;;  %vm32_vm5 = vcmask 130048   ;;  %vm84_vm6 = vcmask 654848  }
   0x5   :  { %17 = vst [vmem:[#allocation2 + $0x18] sm:$0xff] %v266_v2  ;;  %v48_v12 = vld [vmem:[%s395_s1 + $0x20] sm:$0xff]  ;;  %v36_v13 = vld [vmem:[%s395_s1 + $0x18] sm:$0xff]  ;;  %v35_v14 = vld [vmem:[%s395_s1 + $0x10] sm:$0xff]  ;;  %vm45_vm7 = vcmask 261248  }
   0x6   :  { %18 = vst [vmem:[#allocation2 + $0x20] sm:$0xff] %v266_v2  ;;  %v31_v21 = vld [vmem:[%s395_s1 + $0x8] sm:$0xff]  ;;  %v30_v22 = vld [vmem:[%s395_s1] sm:$0xff] }
   0x7   :  { %19 = vst [vmem:[#allocation2 + $0x28] sm:$0xff] %v266_v2  ;;  %v263_v44 = vld [vmem:[%s396_s2] ss:$0 sm:$0xff]  ;;  %v127_v47 = vld [vmem:[%s397_s0 + $0x8] sm:$0xff] }
   0x8   :  { %20 = vst [vmem:[#allocation2 + $0x30] sm:$0xff] %v266_v2  ;;  %v126_v46 = vld [vmem:[%s397_s0] sm:$0xff]  ;;  %v133_v51 = vmul.f32 %v263_v44, %v127_v47 }
   0x9   :  { %21 = vst [vmem:[#allocation2 + $0x38] sm:$0xff] %v266_v2  ;;  %v132_v50 = vmul.f32 %v263_v44, %v126_v46 }
   0xa   :  { %117 = vrot.lane.b32.xlu0 %v113_v4, %s264_s16  ;;  %104 = vrot.lane.b32.xlu1 %v100_v5, %s265_s17  ;;  %22 = vst [vmem:[#allocation2 + $0x40] sm:$0xff] %v266_v2 }
   0xb   :  { %91 = vrot.lane.b32.xlu2 %v87_v6, %s267_s20  ;;  %23 = vst [vmem:[#allocation2 + $0x48] sm:$0xff] %v266_v2 }
   0xc   :  { %24 = vst [vmem:[#allocation2 + $0x50] sm:$0xff] %v266_v2 }
   0xd   :  { %25 = vst [vmem:[#allocation2 + $0x58] sm:$0xff] %v266_v2 }
   0xe   :  { %26 = vst [vmem:[#allocation2 + $0x60] sm:$0xff] %v266_v2 }
   0xf   :  { %27 = vst [vmem:[#allocation2 + $0x68] sm:$0xff] %v266_v2 }
  0x10   :  { %28 = vst [vmem:[#allocation2 + $0x70] sm:$0xff] %v266_v2 }
  0x11   :  { %34 = vst.msk [vmem:[#allocation2 + $0x8] sm:$0xff] %vm32_vm5, %v31_v21 }
  0x12   :  { %80 = vrot.lane.b32.xlu0 %v75_v7, %s268_s4  ;;  %78 = vrot.lane.b32.xlu1 %v74_v8, %s268_s4  ;;  %33 = vst.msk [vmem:[#allocation2] sm:$0xff] %vm32_vm5, %v30_v22 }
  0x13   :  { %67 = vrot.lane.b32.xlu2 %v62_v9, %s269_s7 }
  0x18   :  { %v135_v48 = vld [vmem:[#allocation2 + $0x8] sm:$0xff] }
  0x19   :  { %v134_v49 = vld [vmem:[#allocation2] sm:$0xff] }
  0x1a   :  { %65 = vrot.lane.b32.xlu0 %v61_v10, %s269_s7  ;;  %54 = vrot.lane.b32.xlu1 %v49_v11, %s270_s12 }
  0x1b   :  { %52 = vrot.lane.b32.xlu2 %v48_v12, %s270_s12 }
  0x22   :  { %41 = vrot.lane.b32.xlu0 %v36_v13, %s271_s22  ;;  %39 = vrot.lane.b32.xlu1 %v35_v14, %s271_s22 }
  0x5d   :  { %v94_v15 = vpop.permute.xlu2 %93 }
  0x5e   :  { %99 = vst.msk [vmem:[#allocation2 + $0x58] sm:$0xff] %vm97_vm0, %v94_v15 }
  0x65   :  { %v92_v16 = vpop.permute.xlu2 %91  ;;  %v145_v31 = vld [vmem:[#allocation2 + $0x58] sm:$0xff] }
  0x66   :  { %98 = vst.msk [vmem:[#allocation2 + $0x50] sm:$0xff] %vm97_vm0, %v92_v16 }
  0x6d   :  { %v68_v17 = vpop.permute.xlu2 %67  ;;  %v144_v33 = vld [vmem:[#allocation2 + $0x50] sm:$0xff] }
  0x6e   :  { %73 = vst.msk [vmem:[#allocation2 + $0x38] sm:$0xff] %vm71_vm1, %v68_v17 }
  0x74   :  { %v120_v18 = vpop.permute.xlu0 %119  ;;  %v107_v19 = vpop.permute.xlu1 %106 }
  0x75   :  { %125 = vst.msk [vmem:[#allocation2 + $0x78] sm:$0xff] %vm123_vm2, %v120_v18  ;;  %v53_v20 = vpop.permute.xlu2 %52  ;;  %v141_v37 = vld [vmem:[#allocation2 + $0x38] sm:$0xff] }
  0x76   :  { %112 = vst.msk [vmem:[#allocation2 + $0x68] sm:$0xff] %vm110_vm3, %v107_v19 }
  0x77   :  { %59 = vst.msk [vmem:[#allocation2 + $0x20] sm:$0xff] %vm58_vm4, %v53_v20 }
  0x7c   :  { %v118_v23 = vpop.permute.xlu0 %117  ;;  %v149_v24 = vld [vmem:[#allocation2 + $0x78] sm:$0xff]  ;;  %v105_v25 = vpop.permute.xlu1 %104 }
  0x7d   :  { %124 = vst.msk [vmem:[#allocation2 + $0x70] sm:$0xff] %vm123_vm2, %v118_v23  ;;  %150 = vmatpush.msra.mxu0 %v149_v24  ;;  %239 = vmatpush.msra.mxu1 %v149_v24  ;;  %v147_v29 = vld [vmem:[#allocation2 + $0x68] sm:$0xff] }
  0x7e   :  { %111 = vst.msk [vmem:[#allocation2 + $0x60] sm:$0xff] %vm110_vm3, %v105_v25  ;;  %v138_v42 = vld [vmem:[#allocation2 + $0x20] sm:$0xff] }
  0x84   :  { %v81_v26 = vpop.permute.xlu0 %80  ;;  %v148_v27 = vld [vmem:[#allocation2 + $0x70] sm:$0xff]  ;;  %v79_v28 = vpop.permute.xlu1 %78 }
  0x85   :  { %86 = vst.msk [vmem:[#allocation2 + $0x48] sm:$0xff] %vm84_vm6, %v81_v26  ;;  %151 = vmatpush.msra.mxu0 %v148_v27  ;;  %240 = vmatpush.msra.mxu1 %v148_v27  ;;  %v146_v30 = vld [vmem:[#allocation2 + $0x60] sm:$0xff] }
  0x86   :  { %85 = vst.msk [vmem:[#allocation2 + $0x40] sm:$0xff] %vm84_vm6, %v79_v28 }
  0x87   :  { %152 = vmatpush.msra.mxu0 %v147_v29  ;;  %241 = vmatpush.msra.mxu1 %v147_v29 }
  0x89   :  { %153 = vmatpush.msra.mxu0 %v146_v30  ;;  %242 = vmatpush.msra.mxu1 %v146_v30 }
  0x8b   :  { %154 = vmatpush.msra.mxu0 %v145_v31  ;;  %243 = vmatpush.msra.mxu1 %v145_v31 }
  0x8c   :  { %v66_v32 = vpop.permute.xlu0 %65  ;;  %v55_v34 = vpop.permute.xlu1 %54  ;;  %v143_v35 = vld [vmem:[#allocation2 + $0x48] sm:$0xff] }
  0x8d   :  { %72 = vst.msk [vmem:[#allocation2 + $0x30] sm:$0xff] %vm71_vm1, %v66_v32  ;;  %155 = vmatpush.msra.mxu0 %v144_v33  ;;  %244 = vmatpush.msra.mxu1 %v144_v33  ;;  %v142_v36 = vld [vmem:[#allocation2 + $0x40] sm:$0xff] }
  0x8e   :  { %60 = vst.msk [vmem:[#allocation2 + $0x28] sm:$0xff] %vm58_vm4, %v55_v34 }
  0x8f   :  { %156 = vmatpush.msra.mxu0 %v143_v35  ;;  %245 = vmatpush.msra.mxu1 %v143_v35 }
  0x91   :  { %157 = vmatpush.msra.mxu0 %v142_v36  ;;  %246 = vmatpush.msra.mxu1 %v142_v36 }
  0x93   :  { %158 = vmatpush.msra.mxu0 %v141_v37  ;;  %247 = vmatpush.msra.mxu1 %v141_v37 }
  0x94   :  { %v42_v38 = vpop.permute.xlu0 %41  ;;  %v140_v39 = vld [vmem:[#allocation2 + $0x30] sm:$0xff]  ;;  %v40_v40 = vpop.permute.xlu1 %39 }
  0x95   :  { %47 = vst.msk [vmem:[#allocation2 + $0x18] sm:$0xff] %vm45_vm7, %v42_v38  ;;  %159 = vmatpush.msra.mxu0 %v140_v39  ;;  %248 = vmatpush.msra.mxu1 %v140_v39  ;;  %v139_v41 = vld [vmem:[#allocation2 + $0x28] sm:$0xff] }
  0x96   :  { %46 = vst.msk [vmem:[#allocation2 + $0x10] sm:$0xff] %vm45_vm7, %v40_v40 }
  0x97   :  { %160 = vmatpush.msra.mxu0 %v139_v41  ;;  %249 = vmatpush.msra.mxu1 %v139_v41 }
  0x99   :  { %161 = vmatpush.msra.mxu0 %v138_v42  ;;  %250 = vmatpush.msra.mxu1 %v138_v42 }
  0x9c   :  { %v137_v43 = vld [vmem:[#allocation2 + $0x18] sm:$0xff] }
  0x9d   :  { %162 = vmatpush.msra.mxu0 %v137_v43  ;;  %251 = vmatpush.msra.mxu1 %v137_v43  ;;  %v136_v45 = vld [vmem:[#allocation2 + $0x10] sm:$0xff] }
  0x9f   :  { %163 = vmatpush.msra.mxu0 %v136_v45  ;;  %252 = vmatpush.msra.mxu1 %v136_v45 }
  0xa1   :  { %164 = vmatpush.msra.mxu0 %v135_v48  ;;  %253 = vmatpush.msra.mxu1 %v135_v48 }
  0xa3   :  { %165 = vmatpush.msra.mxu0 %v134_v49  ;;  %254 = vmatpush.msra.mxu1 %v134_v49 }
  0xa4   :  { %166 = vmatmul.f32.vlgmr.msra.gmra.mxu0 %v132_v50  ;;  %169 = vmatmul.f32.vlgmr.msra.gmra.mxu1 %v133_v51 }
 0x121   :  { %v167_v52 = vpop.f32.mrf.mxu0  ;;  %v170_v53 = vpop.f32.mrf.mxu1 }
 0x122   :  { %177 = vrot.lane.b32.xlu0 %v170_v53, %s264_s16  ;;  %183 = vrot.lane.b32.xlu1 %v167_v52, %s265_s17 }
 0x123   :  { %175 = vrot.lane.b32.xlu2 %v167_v52, %s264_s16 }
 0x12a   :  { %191 = vrot.lane.b32.xlu0 %v167_v52, %s267_s20  ;;  %193 = vrot.lane.b32.xlu1 %v170_v53, %s267_s20 }
 0x12b   :  { %185 = vrot.lane.b32.xlu2 %v170_v53, %s265_s17 }
 0x132   :  { %201 = vrot.lane.b32.xlu0 %v170_v53, %s268_s4  ;;  %207 = vrot.lane.b32.xlu1 %v167_v52, %s269_s7 }
 0x133   :  { %199 = vrot.lane.b32.xlu2 %v167_v52, %s268_s4 }
 0x13a   :  { %215 = vrot.lane.b32.xlu0 %v167_v52, %s270_s12  ;;  %217 = vrot.lane.b32.xlu1 %v170_v53, %s270_s12 }
 0x13b   :  { %209 = vrot.lane.b32.xlu2 %v170_v53, %s269_s7 }
 0x142   :  { %225 = vrot.lane.b32.xlu0 %v170_v53, %s271_s22 }
 0x143   :  { %223 = vrot.lane.b32.xlu2 %v167_v52, %s271_s22 }
 0x17d   :  { %v176_v54 = vpop.permute.xlu2 %175 }
 0x17e   :  { %v181_v61 = vadd.f32 %v176_v54, %v167_v52 }
 0x185   :  { %v186_v55 = vpop.permute.xlu2 %185 }
 0x18d   :  { %v200_v58 = vpop.permute.xlu2 %199 }
 0x194   :  { %v178_v56 = vpop.permute.xlu0 %177  ;;  %v184_v57 = vpop.permute.xlu1 %183 }
 0x195   :  { %v189_v62 = vadd.f32 %v184_v57, %v181_v61  ;;  %v210_v63 = vpop.permute.xlu2 %209  ;;  %v182_v1 = vadd.f32 %v178_v56, %v170_v53 }
 0x197   :  { %v190_v4 = vadd.f32 %v186_v55, %v182_v1 }
 0x19c   :  { %v192_v59 = vpop.permute.xlu0 %191  ;;  %v194_v60 = vpop.permute.xlu1 %193 }
 0x19d   :  { %v197_v2 = vadd.f32 %v192_v59, %v189_v62  ;;  %v198_v6 = vadd.f32 %v194_v60, %v190_v4  ;;  %v224_v11 = vpop.permute.xlu2 %223 }
 0x19f   :  { %v205_v5 = vadd.f32 %v200_v58, %v197_v2 }
 0x1a4   :  { %v202_v0 = vpop.permute.xlu0 %201  ;;  %v208_v3 = vpop.permute.xlu1 %207 }
 0x1a5   :  { %v213_v7 = vadd.f32 %v208_v3, %v205_v5  ;;  %v206_v9 = vadd.f32 %v202_v0, %v198_v6 }
 0x1a7   :  { %v214_v15 = vadd.f32 %v210_v63, %v206_v9 }
 0x1ac   :  { %v216_v8 = vpop.permute.xlu0 %215  ;;  %v218_v13 = vpop.permute.xlu1 %217 }
 0x1ad   :  { %v221_v10 = vadd.f32 %v216_v8, %v213_v7  ;;  %v222_v16 = vadd.f32 %v218_v13, %v214_v15 }
 0x1af   :  { %v229_v12 = vadd.f32 %v224_v11, %v221_v10 }
 0x1b1   :  { %v231_v14 = vmul.f32 0.125, %v229_v12 }
 0x1b3   :  { %233 = vst.msk [vmem:[%s398_s3] sm:$0xff] %vm32_vm5, %v231_v14 }
 0x1b4   :  { %v226_v17 = vpop.permute.xlu0 %225 }
 0x1b5   :  { %v230_v18 = vadd.f32 %v226_v17, %v222_v16 }
 0x1b7   :  { %v232_v19 = vmul.f32 0.125, %v230_v18 }
 0x1b9   :  { %234 = vst.msk [vmem:[%s398_s3 + $0x8] sm:$0xff] %vm32_vm5, %v232_v19 }

// kernel: riemannian_batch_norm_fwd.7
= control target key start
LH: loop header
LB: loop body
LE: loop exit
PB: predicated region body
PF: predicated region fallthrough
CT: control target
= control target key end

     0   :  { %s204_s16 = smov 112   ;;  %s205_s17 = smov 96   ;;  %v206_v2 = vmov 0.0   ;;  %vm97_vm0 = vcmask 786048   ;;  %vm71_vm1 = vcmask 523648   ;;  %vm123_vm2 = vcmask 1048448   ;;  %s303_s1 = inlined_call_operand.vmem [shape: f32[128,16], index: 1, kind: input, shape index: {}]   ;;  %s304_s2 = inlined_call_operand.vmem [shape: f32[1,128], index: 2, kind: input, shape index: {}]   ;;  %s305_s0 = inlined_call_operand.vmem [shape: f32[16,128], index: 0, kind: input, shape index: {}]   ;;  %s306_s3 = inlined_call_operand.vmem [shape: f32[16,128], index: 3, kind: output, shape index: {}]  }
   0x1   :  { %v114_v0 = vld [vmem:[%s303_s1 + $0x78] sm:$0xff]  ;;  %v101_v1 = vld [vmem:[%s303_s1 + $0x68] sm:$0xff]  ;;  %29 = vst [vmem:[#allocation2 + $0x78] sm:$0xff] %v206_v2  ;;  %s207_s20 = smov 80   ;;  %v113_v4 = vld [vmem:[%s303_s1 + $0x70] sm:$0xff]  ;;  %s208_s4 = smov 64  }
   0x2   :  { %119 = vrot.lane.b32.xlu0 %v114_v0, %s204_s16  ;;  %106 = vrot.lane.b32.xlu1 %v101_v1, %s205_s17  ;;  %v88_v3 = vld [vmem:[%s303_s1 + $0x58] sm:$0xff]  ;;  %14 = vst [vmem:[#allocation2] sm:$0xff] %v206_v2  ;;  %v100_v5 = vld [vmem:[%s303_s1 + $0x60] sm:$0xff]  ;;  %s209_s7 = smov 48   ;;  %s210_s12 = smov 32   ;;  %vm110_vm3 = vcmask 917248  }
   0x3   :  { %93 = vrot.lane.b32.xlu2 %v88_v3, %s207_s20  ;;  %15 = vst [vmem:[#allocation2 + $0x8] sm:$0xff] %v206_v2  ;;  %v87_v6 = vld [vmem:[%s303_s1 + $0x50] sm:$0xff]  ;;  %v75_v7 = vld [vmem:[%s303_s1 + $0x48] sm:$0xff]  ;;  %v74_v8 = vld [vmem:[%s303_s1 + $0x40] sm:$0xff]  ;;  %s211_s19 = smov 16   ;;  %vm58_vm4 = vcmask 392448  }
   0x4   :  { %16 = vst [vmem:[#allocation2 + $0x10] sm:$0xff] %v206_v2  ;;  %v62_v9 = vld [vmem:[%s303_s1 + $0x38] sm:$0xff]  ;;  %v61_v10 = vld [vmem:[%s303_s1 + $0x30] sm:$0xff]  ;;  %v49_v11 = vld [vmem:[%s303_s1 + $0x28] sm:$0xff]  ;;  %vm32_vm5 = vcmask 130048   ;;  %vm84_vm6 = vcmask 654848  }
   0x5   :  { %17 = vst [vmem:[#allocation2 + $0x18] sm:$0xff] %v206_v2  ;;  %v48_v12 = vld [vmem:[%s303_s1 + $0x20] sm:$0xff]  ;;  %v36_v13 = vld [vmem:[%s303_s1 + $0x18] sm:$0xff]  ;;  %v35_v14 = vld [vmem:[%s303_s1 + $0x10] sm:$0xff]  ;;  %vm45_vm7 = vcmask 261248  }
   0x6   :  { %18 = vst [vmem:[#allocation2 + $0x20] sm:$0xff] %v206_v2  ;;  %v31_v21 = vld [vmem:[%s303_s1 + $0x8] sm:$0xff]  ;;  %v30_v22 = vld [vmem:[%s303_s1] sm:$0xff] }
   0x7   :  { %19 = vst [vmem:[#allocation2 + $0x28] sm:$0xff] %v206_v2  ;;  %v203_v44 = vld [vmem:[%s304_s2] ss:$0 sm:$0xff]  ;;  %v127_v47 = vld [vmem:[%s305_s0 + $0x8] sm:$0xff] }
   0x8   :  { %20 = vst [vmem:[#allocation2 + $0x30] sm:$0xff] %v206_v2  ;;  %v126_v46 = vld [vmem:[%s305_s0] sm:$0xff]  ;;  %v133_v51 = vmul.f32 %v203_v44, %v127_v47 }
   0x9   :  { %21 = vst [vmem:[#allocation2 + $0x38] sm:$0xff] %v206_v2  ;;  %v132_v50 = vmul.f32 %v203_v44, %v126_v46 }
   0xa   :  { %117 = vrot.lane.b32.xlu0 %v113_v4, %s204_s16  ;;  %104 = vrot.lane.b32.xlu1 %v100_v5, %s205_s17  ;;  %22 = vst [vmem:[#allocation2 + $0x40] sm:$0xff] %v206_v2 }
   0xb   :  { %91 = vrot.lane.b32.xlu2 %v87_v6, %s207_s20  ;;  %23 = vst [vmem:[#allocation2 + $0x48] sm:$0xff] %v206_v2 }
   0xc   :  { %24 = vst [vmem:[#allocation2 + $0x50] sm:$0xff] %v206_v2 }
   0xd   :  { %25 = vst [vmem:[#allocation2 + $0x58] sm:$0xff] %v206_v2 }
   0xe   :  { %26 = vst [vmem:[#allocation2 + $0x60] sm:$0xff] %v206_v2 }
   0xf   :  { %27 = vst [vmem:[#allocation2 + $0x68] sm:$0xff] %v206_v2 }
  0x10   :  { %28 = vst [vmem:[#allocation2 + $0x70] sm:$0xff] %v206_v2 }
  0x11   :  { %34 = vst.msk [vmem:[#allocation2 + $0x8] sm:$0xff] %vm32_vm5, %v31_v21 }
  0x12   :  { %80 = vrot.lane.b32.xlu0 %v75_v7, %s208_s4  ;;  %78 = vrot.lane.b32.xlu1 %v74_v8, %s208_s4  ;;  %33 = vst.msk [vmem:[#allocation2] sm:$0xff] %vm32_vm5, %v30_v22 }
  0x13   :  { %67 = vrot.lane.b32.xlu2 %v62_v9, %s209_s7 }
  0x18   :  { %v135_v48 = vld [vmem:[#allocation2 + $0x8] sm:$0xff] }
  0x19   :  { %v134_v49 = vld [vmem:[#allocation2] sm:$0xff] }
  0x1a   :  { %65 = vrot.lane.b32.xlu0 %v61_v10, %s209_s7  ;;  %54 = vrot.lane.b32.xlu1 %v49_v11, %s210_s12 }
  0x1b   :  { %52 = vrot.lane.b32.xlu2 %v48_v12, %s210_s12 }
  0x22   :  { %41 = vrot.lane.b32.xlu0 %v36_v13, %s211_s19  ;;  %39 = vrot.lane.b32.xlu1 %v35_v14, %s211_s19 }
  0x5d   :  { %v94_v15 = vpop.permute.xlu2 %93 }
  0x5e   :  { %99 = vst.msk [vmem:[#allocation2 + $0x58] sm:$0xff] %vm97_vm0, %v94_v15 }
  0x65   :  { %v92_v16 = vpop.permute.xlu2 %91  ;;  %v145_v31 = vld [vmem:[#allocation2 + $0x58] sm:$0xff] }
  0x66   :  { %98 = vst.msk [vmem:[#allocation2 + $0x50] sm:$0xff] %vm97_vm0, %v92_v16 }
  0x6d   :  { %v68_v17 = vpop.permute.xlu2 %67  ;;  %v144_v33 = vld [vmem:[#allocation2 + $0x50] sm:$0xff] }
  0x6e   :  { %73 = vst.msk [vmem:[#allocation2 + $0x38] sm:$0xff] %vm71_vm1, %v68_v17 }
  0x74   :  { %v120_v18 = vpop.permute.xlu0 %119  ;;  %v107_v19 = vpop.permute.xlu1 %106 }
  0x75   :  { %125 = vst.msk [vmem:[#allocation2 + $0x78] sm:$0xff] %vm123_vm2, %v120_v18  ;;  %v53_v20 = vpop.permute.xlu2 %52  ;;  %v141_v37 = vld [vmem:[#allocation2 + $0x38] sm:$0xff] }
  0x76   :  { %112 = vst.msk [vmem:[#allocation2 + $0x68] sm:$0xff] %vm110_vm3, %v107_v19 }
  0x77   :  { %59 = vst.msk [vmem:[#allocation2 + $0x20] sm:$0xff] %vm58_vm4, %v53_v20 }
  0x7c   :  { %v118_v23 = vpop.permute.xlu0 %117  ;;  %v149_v24 = vld [vmem:[#allocation2 + $0x78] sm:$0xff]  ;;  %v105_v25 = vpop.permute.xlu1 %104 }
  0x7d   :  { %124 = vst.msk [vmem:[#allocation2 + $0x70] sm:$0xff] %vm123_vm2, %v118_v23  ;;  %150 = vmatpush.msra.mxu0 %v149_v24  ;;  %179 = vmatpush.msra.mxu1 %v149_v24  ;;  %v147_v29 = vld [vmem:[#allocation2 + $0x68] sm:$0xff] }
  0x7e   :  { %111 = vst.msk [vmem:[#allocation2 + $0x60] sm:$0xff] %vm110_vm3, %v105_v25  ;;  %v138_v42 = vld [vmem:[#allocation2 + $0x20] sm:$0xff] }
  0x84   :  { %v81_v26 = vpop.permute.xlu0 %80  ;;  %v148_v27 = vld [vmem:[#allocation2 + $0x70] sm:$0xff]  ;;  %v79_v28 = vpop.permute.xlu1 %78 }
  0x85   :  { %86 = vst.msk [vmem:[#allocation2 + $0x48] sm:$0xff] %vm84_vm6, %v81_v26  ;;  %151 = vmatpush.msra.mxu0 %v148_v27  ;;  %180 = vmatpush.msra.mxu1 %v148_v27  ;;  %v146_v30 = vld [vmem:[#allocation2 + $0x60] sm:$0xff] }
  0x86   :  { %85 = vst.msk [vmem:[#allocation2 + $0x40] sm:$0xff] %vm84_vm6, %v79_v28 }
  0x87   :  { %152 = vmatpush.msra.mxu0 %v147_v29  ;;  %181 = vmatpush.msra.mxu1 %v147_v29 }
  0x89   :  { %153 = vmatpush.msra.mxu0 %v146_v30  ;;  %182 = vmatpush.msra.mxu1 %v146_v30 }
  0x8b   :  { %154 = vmatpush.msra.mxu0 %v145_v31  ;;  %183 = vmatpush.msra.mxu1 %v145_v31 }
  0x8c   :  { %v66_v32 = vpop.permute.xlu0 %65  ;;  %v55_v34 = vpop.permute.xlu1 %54  ;;  %v143_v35 = vld [vmem:[#allocation2 + $0x48] sm:$0xff] }
  0x8d   :  { %72 = vst.msk [vmem:[#allocation2 + $0x30] sm:$0xff] %vm71_vm1, %v66_v32  ;;  %155 = vmatpush.msra.mxu0 %v144_v33  ;;  %184 = vmatpush.msra.mxu1 %v144_v33  ;;  %v142_v36 = vld [vmem:[#allocation2 + $0x40] sm:$0xff] }
  0x8e   :  { %60 = vst.msk [vmem:[#allocation2 + $0x28] sm:$0xff] %vm58_vm4, %v55_v34 }
  0x8f   :  { %156 = vmatpush.msra.mxu0 %v143_v35  ;;  %185 = vmatpush.msra.mxu1 %v143_v35 }
  0x91   :  { %157 = vmatpush.msra.mxu0 %v142_v36  ;;  %186 = vmatpush.msra.mxu1 %v142_v36 }
  0x93   :  { %158 = vmatpush.msra.mxu0 %v141_v37  ;;  %187 = vmatpush.msra.mxu1 %v141_v37 }
  0x94   :  { %v42_v38 = vpop.permute.xlu0 %41  ;;  %v140_v39 = vld [vmem:[#allocation2 + $0x30] sm:$0xff]  ;;  %v40_v40 = vpop.permute.xlu1 %39 }
  0x95   :  { %47 = vst.msk [vmem:[#allocation2 + $0x18] sm:$0xff] %vm45_vm7, %v42_v38  ;;  %159 = vmatpush.msra.mxu0 %v140_v39  ;;  %188 = vmatpush.msra.mxu1 %v140_v39  ;;  %v139_v41 = vld [vmem:[#allocation2 + $0x28] sm:$0xff] }
  0x96   :  { %46 = vst.msk [vmem:[#allocation2 + $0x10] sm:$0xff] %vm45_vm7, %v40_v40 }
  0x97   :  { %160 = vmatpush.msra.mxu0 %v139_v41  ;;  %189 = vmatpush.msra.mxu1 %v139_v41 }
  0x99   :  { %161 = vmatpush.msra.mxu0 %v138_v42  ;;  %190 = vmatpush.msra.mxu1 %v138_v42 }
  0x9c   :  { %v137_v43 = vld [vmem:[#allocation2 + $0x18] sm:$0xff] }
  0x9d   :  { %162 = vmatpush.msra.mxu0 %v137_v43  ;;  %191 = vmatpush.msra.mxu1 %v137_v43  ;;  %v136_v45 = vld [vmem:[#allocation2 + $0x10] sm:$0xff] }
  0x9f   :  { %163 = vmatpush.msra.mxu0 %v136_v45  ;;  %192 = vmatpush.msra.mxu1 %v136_v45 }
  0xa1   :  { %164 = vmatpush.msra.mxu0 %v135_v48  ;;  %193 = vmatpush.msra.mxu1 %v135_v48 }
  0xa3   :  { %165 = vmatpush.msra.mxu0 %v134_v49  ;;  %194 = vmatpush.msra.mxu1 %v134_v49 }
  0xa4   :  { %166 = vmatmul.f32.vlgmr.msra.gmra.mxu0 %v132_v50  ;;  %169 = vmatmul.f32.vlgmr.msra.gmra.mxu1 %v133_v51 }
 0x121   :  { %v167_v52 = vpop.f32.mrf.mxu0  ;;  %v170_v53 = vpop.f32.mrf.mxu1 }
 0x122   :  { %173 = vst [vmem:[%s306_s3] sm:$0xff] %v167_v52 }
 0x123   :  { %174 = vst [vmem:[%s306_s3 + $0x8] sm:$0xff] %v170_v53 }

</bundles_post_ra>
